<compile_context>
chip_gen: v5e
topology: v5e:2x2
jax: 0.10.0
libtpu: 0.0.40
codegen_flags: <defaults>
</compile_context>

<pallas_src>
import jax
import jax.numpy as jnp
from jax.experimental import pallas as pl
from jax.experimental.pallas import tpu as pltpu

# ----------------------------------------------------------------------------
# Model dimensions (from the PyTorch module __init__)
# ----------------------------------------------------------------------------
LAYER_DIMS = [(640, 128), (128, 128), (128, 128), (128, 128), (128, 8),
              (8, 128), (128, 128), (128, 128), (128, 128), (128, 640)]
BN_DIMS = [128, 128, 128, 128, 8, 128, 128, 128, 128]
EPS = 1e-5
N_LAYERS = len(LAYER_DIMS)   # 10 linear layers
N_BN = len(BN_DIMS)          # 9 batchnorm layers
PAD = 128                    # lane-padded width of the 8-wide bottleneck


# ----------------------------------------------------------------------------
# Pallas kernel: whole forward pass (matmuls + batchnorm + relu) in VMEM
# ----------------------------------------------------------------------------
def autoencoder_kernel(x_ref, w0_ref, wmid_ref, w9_ref, g_ref, bt_ref, b9_ref,
                       out_ref):
    inv_n = 1.0 / x_ref.shape[0]

    def bn_relu(h, i):
        # BatchNorm1d in PyTorch training mode: per-feature batch statistics,
        # biased variance, eps=1e-5, then affine (gamma folded into scale).
        s1 = jnp.sum(h, axis=0, keepdims=True)
        s2 = jnp.sum(h * h, axis=0, keepdims=True)
        mean = s1 * inv_n
        var = jnp.maximum(s2 * inv_n - mean * mean, 0.0)
        g_row = g_ref[pl.ds(i, 1), :]                       # (1, 128)
        bt_row = bt_ref[pl.ds(i, 1), :]                     # (1, 128)
        scale = g_row * jax.lax.rsqrt(var + EPS)            # (1, 128)
        h = (h - mean) * scale + bt_row
        return jnp.maximum(h, 0.0)

    # Layer 0: 640 -> 128 (bias dropped: cancelled by the following BN).
    h = jnp.dot(x_ref[...].astype(jnp.bfloat16), w0_ref[...],
                preferred_element_type=jnp.float32)
    h = bn_relu(h, 0)

    # Layers 1..8 (the 128->8->128 bottleneck is zero-padded to 128 lanes).
    for j in range(8):
        h = jnp.dot(h.astype(jnp.bfloat16), wmid_ref[j],
                    preferred_element_type=jnp.float32)
        h = bn_relu(h, j + 1)

    # Layer 9: 128 -> 640, bias applied, no BN / ReLU.
    h = jnp.dot(h.astype(jnp.bfloat16), w9_ref[...],
                preferred_element_type=jnp.float32)
    out_ref[...] = (h + b9_ref[...]).astype(out_ref.dtype)


# ----------------------------------------------------------------------------
# Parameter packing (PyTorch layout -> 6 flat kernel operands)
# ----------------------------------------------------------------------------
def pack_params(weights, biases, gammas, betas):
    """weights[i]: (out, in); biases[i]: (out,); gammas/betas[i]: (C,)."""
    w_t = [w.T for w in weights]                            # (in, out)
    w0 = w_t[0].astype(jnp.bfloat16)                        # (640, 128)

    mid = []
    for i in range(1, 9):
        w = w_t[i]
        wp = jnp.zeros((PAD, PAD), jnp.float32)
        wp = wp.at[:w.shape[0], :w.shape[1]].set(w)         # pad 8-dim to 128
        mid.append(wp)
    w_mid = jnp.stack(mid).astype(jnp.bfloat16)             # (8, 128, 128)

    w9 = w_t[9].astype(jnp.bfloat16)                        # (128, 640)

    g_rows, bt_rows = [], []
    for i in range(N_BN):
        g = jnp.zeros((PAD,), jnp.float32).at[:BN_DIMS[i]].set(gammas[i])
        bt = jnp.zeros((PAD,), jnp.float32).at[:BN_DIMS[i]].set(betas[i])
        g_rows.append(g)
        bt_rows.append(bt)
    g_pack = jnp.stack(g_rows)                              # (9, 128)
    bt_pack = jnp.stack(bt_rows)                            # (9, 128)

    b9 = biases[9].reshape(1, -1).astype(jnp.float32)       # (1, 640)
    # Biases of layers 0..8 are intentionally not passed to the kernel: the
    # batch-mean subtraction of the following BatchNorm cancels them exactly.
    return w0, w_mid, w9, g_pack, bt_pack, b9


# ----------------------------------------------------------------------------
# Wrapper
# ----------------------------------------------------------------------------
@jax.jit
def autoencoder_forward(x, w0, w_mid, w9, g_pack, bt_pack, b9):
    batch = x.shape[0]
    vmem = pl.BlockSpec(memory_space=pltpu.MemorySpace.VMEM)
    return pl.pallas_call(
        autoencoder_kernel,
        out_shape=jax.ShapeDtypeStruct((batch, LAYER_DIMS[-1][1]), jnp.float32),
        in_specs=[vmem] * 7,
        out_specs=vmem,
    )(x, w0, w_mid, w9, g_pack, bt_pack, b9)


# ----------------------------------------------------------------------------
# Deterministic parameter init (PyTorch Linear default ranges; BN affine drawn
# randomly so the test is non-trivial)
# ----------------------------------------------------------------------------
def init_params(key):
    weights, biases, gammas, betas = [], [], [], []
    for (fan_in, fan_out) in LAYER_DIMS:
        key, kw, kb = jax.random.split(key, 3)
        bound = 1.0 / jnp.sqrt(jnp.float32(fan_in))
        weights.append(jax.random.uniform(kw, (fan_out, fan_in), jnp.float32,
                                          -bound, bound))
        biases.append(jax.random.uniform(kb, (fan_out,), jnp.float32,
                                         -bound, bound))
    for c in BN_DIMS:
        key, kg, kbt = jax.random.split(key, 3)
        gammas.append(1.0 + 0.1 * jax.random.normal(kg, (c,), jnp.float32))
        betas.append(0.1 * jax.random.normal(kbt, (c,), jnp.float32))
    return weights, biases, gammas, betas


# ----------------------------------------------------------------------------
# Pure-JAX references
# ----------------------------------------------------------------------------
def reference_f32(x, weights, biases, gammas, betas):
    """Full-fidelity fp32 reference matching the PyTorch module."""
    h = x.astype(jnp.float32)
    for i in range(N_LAYERS):
        h = h @ weights[i].T + biases[i]
        if i < N_BN:
            mean = jnp.mean(h, axis=0, keepdims=True)
            var = jnp.mean((h - mean) ** 2, axis=0, keepdims=True)
            h = (h - mean) / jnp.sqrt(var + EPS)
            h = h * gammas[i] + betas[i]
            h = jnp.maximum(h, 0.0)
    return h


def reference_matched(x, weights, biases, gammas, betas):
    """Same math as the kernel: bf16 dot operands, f32 accumulation/BN."""
    h = x.astype(jnp.float32)
    for i in range(N_LAYERS):
        h = jnp.dot(h.astype(jnp.bfloat16), weights[i].T.astype(jnp.bfloat16),
                    preferred_element_type=jnp.float32)
        if i < N_BN:
            mean = jnp.mean(h, axis=0, keepdims=True)
            var = jnp.maximum(jnp.mean(h * h, axis=0, keepdims=True)
                              - mean * mean, 0.0)
            h = (h - mean) * (gammas[i] * jax.lax.rsqrt(var + EPS)) + betas[i]
            h = jnp.maximum(h, 0.0)
        else:
            h = h + biases[i]
    return h


if __name__ == "__main__":
    key = jax.random.PRNGKey(0)
    key, kx, kp = jax.random.split(key, 3)

    batch = 16  # multiple of 8 sublanes; BN needs a real batch
    x = jax.random.normal(kx, (batch, LAYER_DIMS[0][0]), jnp.float32)
    weights, biases, gammas, betas = init_params(kp)
    packed = pack_params(weights, biases, gammas, betas)

    out = jax.block_until_ready(autoencoder_forward(x, *packed))
    assert out.shape == (batch, LAYER_DIMS[-1][1])

    # Tight check against a matched-precision (bf16-matmul) reference.
    ref_match = reference_matched(x, weights, biases, gammas, betas)
    assert jnp.allclose(out, ref_match, atol=2e-3, rtol=2e-3), \
        "mismatch vs matched-precision reference"

    # Loose sanity check against the full fp32 PyTorch-equivalent reference
    # (bf16 matmul operands introduce small, bounded deviations).
    ref32 = reference_f32(x, weights, biases, gammas, betas)
    assert jnp.allclose(out, ref32, atol=1e-1, rtol=1e-1), \
        "mismatch vs fp32 reference"

    print("KERNEL_OK")
</pallas_src>

<mosaic_0001>
module attributes {stable_mosaic.version = 11 : i64} {
  func.func @autoencoder_kernel(%arg0: memref<16x640xf32, #tpu.memory_space<vmem>>, %arg1: memref<640x128xbf16, #tpu.memory_space<vmem>>, %arg2: memref<8x128x128xbf16, #tpu.memory_space<vmem>>, %arg3: memref<128x640xbf16, #tpu.memory_space<vmem>>, %arg4: memref<9x128xf32, #tpu.memory_space<vmem>>, %arg5: memref<9x128xf32, #tpu.memory_space<vmem>>, %arg6: memref<1x640xf32, #tpu.memory_space<vmem>>, %arg7: memref<16x640xf32, #tpu.memory_space<vmem>>) attributes {dimension_semantics = [], scalar_prefetch = 0 : i64, scratch_operands = 0 : i64, tpu.core_type = #tpu.core_type<tc>} {
    %c0 = arith.constant 0 : index
    %c0_0 = arith.constant 0 : index
    %0 = vector.load %arg0[%c0, %c0_0] : memref<16x640xf32, #tpu.memory_space<vmem>>, vector<16x640xf32>
    %1 = arith.truncf %0 : vector<16x640xf32> to vector<16x640xbf16>
    %c0_1 = arith.constant 0 : index
    %c0_2 = arith.constant 0 : index
    %2 = vector.load %arg1[%c0_1, %c0_2] : memref<640x128xbf16, #tpu.memory_space<vmem>>, vector<640x128xbf16>
    %cst = arith.constant dense<0.000000e+00> : vector<16x128xf32>
    %3 = tpu.matmul %1, %2, %cst {dimension_numbers = #tpu.dot_dimension_numbers<[1], [0], [0], [1], [0, 0, 1, 1], [], []>} : vector<16x640xbf16>, vector<640x128xbf16>, vector<16x128xf32> -> vector<16x128xf32>
    %cst_3 = arith.constant dense<0.000000e+00> : vector<128xf32>
    %4 = vector.multi_reduction <add>, %3, %cst_3 [0] : vector<16x128xf32> to vector<128xf32>
    %5 = vector.shape_cast %4 : vector<128xf32> to vector<1x128xf32>
    %6 = arith.mulf %3, %3 : vector<16x128xf32>
    %cst_4 = arith.constant dense<0.000000e+00> : vector<128xf32>
    %7 = vector.multi_reduction <add>, %6, %cst_4 [0] : vector<16x128xf32> to vector<128xf32>
    %8 = vector.shape_cast %7 : vector<128xf32> to vector<1x128xf32>
    %cst_5 = arith.constant 6.250000e-02 : f32
    %9 = vector.broadcast %cst_5 : f32 to vector<1x128xf32>
    %10 = arith.mulf %5, %9 : vector<1x128xf32>
    %cst_6 = arith.constant 6.250000e-02 : f32
    %11 = vector.broadcast %cst_6 : f32 to vector<1x128xf32>
    %12 = arith.mulf %8, %11 : vector<1x128xf32>
    %13 = arith.mulf %10, %10 : vector<1x128xf32>
    %14 = arith.subf %12, %13 : vector<1x128xf32>
    %cst_7 = arith.constant 0.000000e+00 : f32
    %15 = vector.broadcast %cst_7 : f32 to vector<1x128xf32>
    %16 = arith.maximumf %14, %15 : vector<1x128xf32>
    %c0_8 = arith.constant 0 : index
    %c0_9 = arith.constant 0 : index
    %17 = vector.load %arg4[%c0_8, %c0_9] : memref<9x128xf32, #tpu.memory_space<vmem>>, vector<1x128xf32>
    %c0_10 = arith.constant 0 : index
    %c0_11 = arith.constant 0 : index
    %18 = vector.load %arg5[%c0_10, %c0_11] : memref<9x128xf32, #tpu.memory_space<vmem>>, vector<1x128xf32>
    %cst_12 = arith.constant 9.99999974E-6 : f32
    %19 = vector.broadcast %cst_12 : f32 to vector<1x128xf32>
    %20 = arith.addf %16, %19 : vector<1x128xf32>
    %21 = math.rsqrt %20 : vector<1x128xf32>
    %22 = arith.mulf %17, %21 : vector<1x128xf32>
    %23 = vector.broadcast %10 : vector<1x128xf32> to vector<16x128xf32>
    %24 = arith.subf %3, %23 : vector<16x128xf32>
    %25 = vector.broadcast %22 : vector<1x128xf32> to vector<16x128xf32>
    %26 = arith.mulf %24, %25 : vector<16x128xf32>
    %27 = vector.broadcast %18 : vector<1x128xf32> to vector<16x128xf32>
    %28 = arith.addf %26, %27 : vector<16x128xf32>
    %cst_13 = arith.constant 0.000000e+00 : f32
    %29 = vector.broadcast %cst_13 : f32 to vector<16x128xf32>
    %30 = arith.maximumf %28, %29 : vector<16x128xf32>
    %31 = arith.truncf %30 : vector<16x128xf32> to vector<16x128xbf16>
    %c0_14 = arith.constant 0 : index
    %c0_15 = arith.constant 0 : index
    %c0_16 = arith.constant 0 : index
    %32 = vector.load %arg2[%c0_14, %c0_15, %c0_16] : memref<8x128x128xbf16, #tpu.memory_space<vmem>>, vector<1x128x128xbf16>
    %33 = vector.shape_cast %32 : vector<1x128x128xbf16> to vector<128x128xbf16>
    %cst_17 = arith.constant dense<0.000000e+00> : vector<16x128xf32>
    %34 = tpu.matmul %31, %33, %cst_17 {dimension_numbers = #tpu.dot_dimension_numbers<[1], [0], [0], [1], [0, 0, 1, 1], [], []>} : vector<16x128xbf16>, vector<128x128xbf16>, vector<16x128xf32> -> vector<16x128xf32>
    %cst_18 = arith.constant dense<0.000000e+00> : vector<128xf32>
    %35 = vector.multi_reduction <add>, %34, %cst_18 [0] : vector<16x128xf32> to vector<128xf32>
    %36 = vector.shape_cast %35 : vector<128xf32> to vector<1x128xf32>
    %37 = arith.mulf %34, %34 : vector<16x128xf32>
    %cst_19 = arith.constant dense<0.000000e+00> : vector<128xf32>
    %38 = vector.multi_reduction <add>, %37, %cst_19 [0] : vector<16x128xf32> to vector<128xf32>
    %39 = vector.shape_cast %38 : vector<128xf32> to vector<1x128xf32>
    %cst_20 = arith.constant 6.250000e-02 : f32
    %40 = vector.broadcast %cst_20 : f32 to vector<1x128xf32>
    %41 = arith.mulf %36, %40 : vector<1x128xf32>
    %cst_21 = arith.constant 6.250000e-02 : f32
    %42 = vector.broadcast %cst_21 : f32 to vector<1x128xf32>
    %43 = arith.mulf %39, %42 : vector<1x128xf32>
    %44 = arith.mulf %41, %41 : vector<1x128xf32>
    %45 = arith.subf %43, %44 : vector<1x128xf32>
    %cst_22 = arith.constant 0.000000e+00 : f32
    %46 = vector.broadcast %cst_22 : f32 to vector<1x128xf32>
    %47 = arith.maximumf %45, %46 : vector<1x128xf32>
    %c1 = arith.constant 1 : index
    %c0_23 = arith.constant 0 : index
    %48 = vector.load %arg4[%c1, %c0_23] : memref<9x128xf32, #tpu.memory_space<vmem>>, vector<1x128xf32>
    %c1_24 = arith.constant 1 : index
    %c0_25 = arith.constant 0 : index
    %49 = vector.load %arg5[%c1_24, %c0_25] : memref<9x128xf32, #tpu.memory_space<vmem>>, vector<1x128xf32>
    %cst_26 = arith.constant 9.99999974E-6 : f32
    %50 = vector.broadcast %cst_26 : f32 to vector<1x128xf32>
    %51 = arith.addf %47, %50 : vector<1x128xf32>
    %52 = math.rsqrt %51 : vector<1x128xf32>
    %53 = arith.mulf %48, %52 : vector<1x128xf32>
    %54 = vector.broadcast %41 : vector<1x128xf32> to vector<16x128xf32>
    %55 = arith.subf %34, %54 : vector<16x128xf32>
    %56 = vector.broadcast %53 : vector<1x128xf32> to vector<16x128xf32>
    %57 = arith.mulf %55, %56 : vector<16x128xf32>
    %58 = vector.broadcast %49 : vector<1x128xf32> to vector<16x128xf32>
    %59 = arith.addf %57, %58 : vector<16x128xf32>
    %cst_27 = arith.constant 0.000000e+00 : f32
    %60 = vector.broadcast %cst_27 : f32 to vector<16x128xf32>
    %61 = arith.maximumf %59, %60 : vector<16x128xf32>
    %62 = arith.truncf %61 : vector<16x128xf32> to vector<16x128xbf16>
    %c1_28 = arith.constant 1 : index
    %c0_29 = arith.constant 0 : index
    %c0_30 = arith.constant 0 : index
    %63 = vector.load %arg2[%c1_28, %c0_29, %c0_30] : memref<8x128x128xbf16, #tpu.memory_space<vmem>>, vector<1x128x128xbf16>
    %64 = vector.shape_cast %63 : vector<1x128x128xbf16> to vector<128x128xbf16>
    %cst_31 = arith.constant dense<0.000000e+00> : vector<16x128xf32>
    %65 = tpu.matmul %62, %64, %cst_31 {dimension_numbers = #tpu.dot_dimension_numbers<[1], [0], [0], [1], [0, 0, 1, 1], [], []>} : vector<16x128xbf16>, vector<128x128xbf16>, vector<16x128xf32> -> vector<16x128xf32>
    %cst_32 = arith.constant dense<0.000000e+00> : vector<128xf32>
    %66 = vector.multi_reduction <add>, %65, %cst_32 [0] : vector<16x128xf32> to vector<128xf32>
    %67 = vector.shape_cast %66 : vector<128xf32> to vector<1x128xf32>
    %68 = arith.mulf %65, %65 : vector<16x128xf32>
    %cst_33 = arith.constant dense<0.000000e+00> : vector<128xf32>
    %69 = vector.multi_reduction <add>, %68, %cst_33 [0] : vector<16x128xf32> to vector<128xf32>
    %70 = vector.shape_cast %69 : vector<128xf32> to vector<1x128xf32>
    %cst_34 = arith.constant 6.250000e-02 : f32
    %71 = vector.broadcast %cst_34 : f32 to vector<1x128xf32>
    %72 = arith.mulf %67, %71 : vector<1x128xf32>
    %cst_35 = arith.constant 6.250000e-02 : f32
    %73 = vector.broadcast %cst_35 : f32 to vector<1x128xf32>
    %74 = arith.mulf %70, %73 : vector<1x128xf32>
    %75 = arith.mulf %72, %72 : vector<1x128xf32>
    %76 = arith.subf %74, %75 : vector<1x128xf32>
    %cst_36 = arith.constant 0.000000e+00 : f32
    %77 = vector.broadcast %cst_36 : f32 to vector<1x128xf32>
    %78 = arith.maximumf %76, %77 : vector<1x128xf32>
    %c2 = arith.constant 2 : index
    %c0_37 = arith.constant 0 : index
    %79 = vector.load %arg4[%c2, %c0_37] : memref<9x128xf32, #tpu.memory_space<vmem>>, vector<1x128xf32>
    %c2_38 = arith.constant 2 : index
    %c0_39 = arith.constant 0 : index
    %80 = vector.load %arg5[%c2_38, %c0_39] : memref<9x128xf32, #tpu.memory_space<vmem>>, vector<1x128xf32>
    %cst_40 = arith.constant 9.99999974E-6 : f32
    %81 = vector.broadcast %cst_40 : f32 to vector<1x128xf32>
    %82 = arith.addf %78, %81 : vector<1x128xf32>
    %83 = math.rsqrt %82 : vector<1x128xf32>
    %84 = arith.mulf %79, %83 : vector<1x128xf32>
    %85 = vector.broadcast %72 : vector<1x128xf32> to vector<16x128xf32>
    %86 = arith.subf %65, %85 : vector<16x128xf32>
    %87 = vector.broadcast %84 : vector<1x128xf32> to vector<16x128xf32>
    %88 = arith.mulf %86, %87 : vector<16x128xf32>
    %89 = vector.broadcast %80 : vector<1x128xf32> to vector<16x128xf32>
    %90 = arith.addf %88, %89 : vector<16x128xf32>
    %cst_41 = arith.constant 0.000000e+00 : f32
    %91 = vector.broadcast %cst_41 : f32 to vector<16x128xf32>
    %92 = arith.maximumf %90, %91 : vector<16x128xf32>
    %93 = arith.truncf %92 : vector<16x128xf32> to vector<16x128xbf16>
    %c2_42 = arith.constant 2 : index
    %c0_43 = arith.constant 0 : index
    %c0_44 = arith.constant 0 : index
    %94 = vector.load %arg2[%c2_42, %c0_43, %c0_44] : memref<8x128x128xbf16, #tpu.memory_space<vmem>>, vector<1x128x128xbf16>
    %95 = vector.shape_cast %94 : vector<1x128x128xbf16> to vector<128x128xbf16>
    %cst_45 = arith.constant dense<0.000000e+00> : vector<16x128xf32>
    %96 = tpu.matmul %93, %95, %cst_45 {dimension_numbers = #tpu.dot_dimension_numbers<[1], [0], [0], [1], [0, 0, 1, 1], [], []>} : vector<16x128xbf16>, vector<128x128xbf16>, vector<16x128xf32> -> vector<16x128xf32>
    %cst_46 = arith.constant dense<0.000000e+00> : vector<128xf32>
    %97 = vector.multi_reduction <add>, %96, %cst_46 [0] : vector<16x128xf32> to vector<128xf32>
    %98 = vector.shape_cast %97 : vector<128xf32> to vector<1x128xf32>
    %99 = arith.mulf %96, %96 : vector<16x128xf32>
    %cst_47 = arith.constant dense<0.000000e+00> : vector<128xf32>
    %100 = vector.multi_reduction <add>, %99, %cst_47 [0] : vector<16x128xf32> to vector<128xf32>
    %101 = vector.shape_cast %100 : vector<128xf32> to vector<1x128xf32>
    %cst_48 = arith.constant 6.250000e-02 : f32
    %102 = vector.broadcast %cst_48 : f32 to vector<1x128xf32>
    %103 = arith.mulf %98, %102 : vector<1x128xf32>
    %cst_49 = arith.constant 6.250000e-02 : f32
    %104 = vector.broadcast %cst_49 : f32 to vector<1x128xf32>
    %105 = arith.mulf %101, %104 : vector<1x128xf32>
    %106 = arith.mulf %103, %103 : vector<1x128xf32>
    %107 = arith.subf %105, %106 : vector<1x128xf32>
    %cst_50 = arith.constant 0.000000e+00 : f32
    %108 = vector.broadcast %cst_50 : f32 to vector<1x128xf32>
    %109 = arith.maximumf %107, %108 : vector<1x128xf32>
    %c3 = arith.constant 3 : index
    %c0_51 = arith.constant 0 : index
    %110 = vector.load %arg4[%c3, %c0_51] : memref<9x128xf32, #tpu.memory_space<vmem>>, vector<1x128xf32>
    %c3_52 = arith.constant 3 : index
    %c0_53 = arith.constant 0 : index
    %111 = vector.load %arg5[%c3_52, %c0_53] : memref<9x128xf32, #tpu.memory_space<vmem>>, vector<1x128xf32>
    %cst_54 = arith.constant 9.99999974E-6 : f32
    %112 = vector.broadcast %cst_54 : f32 to vector<1x128xf32>
    %113 = arith.addf %109, %112 : vector<1x128xf32>
    %114 = math.rsqrt %113 : vector<1x128xf32>
    %115 = arith.mulf %110, %114 : vector<1x128xf32>
    %116 = vector.broadcast %103 : vector<1x128xf32> to vector<16x128xf32>
    %117 = arith.subf %96, %116 : vector<16x128xf32>
    %118 = vector.broadcast %115 : vector<1x128xf32> to vector<16x128xf32>
    %119 = arith.mulf %117, %118 : vector<16x128xf32>
    %120 = vector.broadcast %111 : vector<1x128xf32> to vector<16x128xf32>
    %121 = arith.addf %119, %120 : vector<16x128xf32>
    %cst_55 = arith.constant 0.000000e+00 : f32
    %122 = vector.broadcast %cst_55 : f32 to vector<16x128xf32>
    %123 = arith.maximumf %121, %122 : vector<16x128xf32>
    %124 = arith.truncf %123 : vector<16x128xf32> to vector<16x128xbf16>
    %c3_56 = arith.constant 3 : index
    %c0_57 = arith.constant 0 : index
    %c0_58 = arith.constant 0 : index
    %125 = vector.load %arg2[%c3_56, %c0_57, %c0_58] : memref<8x128x128xbf16, #tpu.memory_space<vmem>>, vector<1x128x128xbf16>
    %126 = vector.shape_cast %125 : vector<1x128x128xbf16> to vector<128x128xbf16>
    %cst_59 = arith.constant dense<0.000000e+00> : vector<16x128xf32>
    %127 = tpu.matmul %124, %126, %cst_59 {dimension_numbers = #tpu.dot_dimension_numbers<[1], [0], [0], [1], [0, 0, 1, 1], [], []>} : vector<16x128xbf16>, vector<128x128xbf16>, vector<16x128xf32> -> vector<16x128xf32>
    %cst_60 = arith.constant dense<0.000000e+00> : vector<128xf32>
    %128 = vector.multi_reduction <add>, %127, %cst_60 [0] : vector<16x128xf32> to vector<128xf32>
    %129 = vector.shape_cast %128 : vector<128xf32> to vector<1x128xf32>
    %130 = arith.mulf %127, %127 : vector<16x128xf32>
    %cst_61 = arith.constant dense<0.000000e+00> : vector<128xf32>
    %131 = vector.multi_reduction <add>, %130, %cst_61 [0] : vector<16x128xf32> to vector<128xf32>
    %132 = vector.shape_cast %131 : vector<128xf32> to vector<1x128xf32>
    %cst_62 = arith.constant 6.250000e-02 : f32
    %133 = vector.broadcast %cst_62 : f32 to vector<1x128xf32>
    %134 = arith.mulf %129, %133 : vector<1x128xf32>
    %cst_63 = arith.constant 6.250000e-02 : f32
    %135 = vector.broadcast %cst_63 : f32 to vector<1x128xf32>
    %136 = arith.mulf %132, %135 : vector<1x128xf32>
    %137 = arith.mulf %134, %134 : vector<1x128xf32>
    %138 = arith.subf %136, %137 : vector<1x128xf32>
    %cst_64 = arith.constant 0.000000e+00 : f32
    %139 = vector.broadcast %cst_64 : f32 to vector<1x128xf32>
    %140 = arith.maximumf %138, %139 : vector<1x128xf32>
    %c4 = arith.constant 4 : index
    %c0_65 = arith.constant 0 : index
    %141 = vector.load %arg4[%c4, %c0_65] : memref<9x128xf32, #tpu.memory_space<vmem>>, vector<1x128xf32>
    %c4_66 = arith.constant 4 : index
    %c0_67 = arith.constant 0 : index
    %142 = vector.load %arg5[%c4_66, %c0_67] : memref<9x128xf32, #tpu.memory_space<vmem>>, vector<1x128xf32>
    %cst_68 = arith.constant 9.99999974E-6 : f32
    %143 = vector.broadcast %cst_68 : f32 to vector<1x128xf32>
    %144 = arith.addf %140, %143 : vector<1x128xf32>
    %145 = math.rsqrt %144 : vector<1x128xf32>
    %146 = arith.mulf %141, %145 : vector<1x128xf32>
    %147 = vector.broadcast %134 : vector<1x128xf32> to vector<16x128xf32>
    %148 = arith.subf %127, %147 : vector<16x128xf32>
    %149 = vector.broadcast %146 : vector<1x128xf32> to vector<16x128xf32>
    %150 = arith.mulf %148, %149 : vector<16x128xf32>
    %151 = vector.broadcast %142 : vector<1x128xf32> to vector<16x128xf32>
    %152 = arith.addf %150, %151 : vector<16x128xf32>
    %cst_69 = arith.constant 0.000000e+00 : f32
    %153 = vector.broadcast %cst_69 : f32 to vector<16x128xf32>
    %154 = arith.maximumf %152, %153 : vector<16x128xf32>
    %155 = arith.truncf %154 : vector<16x128xf32> to vector<16x128xbf16>
    %c4_70 = arith.constant 4 : index
    %c0_71 = arith.constant 0 : index
    %c0_72 = arith.constant 0 : index
    %156 = vector.load %arg2[%c4_70, %c0_71, %c0_72] : memref<8x128x128xbf16, #tpu.memory_space<vmem>>, vector<1x128x128xbf16>
    %157 = vector.shape_cast %156 : vector<1x128x128xbf16> to vector<128x128xbf16>
    %cst_73 = arith.constant dense<0.000000e+00> : vector<16x128xf32>
    %158 = tpu.matmul %155, %157, %cst_73 {dimension_numbers = #tpu.dot_dimension_numbers<[1], [0], [0], [1], [0, 0, 1, 1], [], []>} : vector<16x128xbf16>, vector<128x128xbf16>, vector<16x128xf32> -> vector<16x128xf32>
    %cst_74 = arith.constant dense<0.000000e+00> : vector<128xf32>
    %159 = vector.multi_reduction <add>, %158, %cst_74 [0] : vector<16x128xf32> to vector<128xf32>
    %160 = vector.shape_cast %159 : vector<128xf32> to vector<1x128xf32>
    %161 = arith.mulf %158, %158 : vector<16x128xf32>
    %cst_75 = arith.constant dense<0.000000e+00> : vector<128xf32>
    %162 = vector.multi_reduction <add>, %161, %cst_75 [0] : vector<16x128xf32> to vector<128xf32>
    %163 = vector.shape_cast %162 : vector<128xf32> to vector<1x128xf32>
    %cst_76 = arith.constant 6.250000e-02 : f32
    %164 = vector.broadcast %cst_76 : f32 to vector<1x128xf32>
    %165 = arith.mulf %160, %164 : vector<1x128xf32>
    %cst_77 = arith.constant 6.250000e-02 : f32
    %166 = vector.broadcast %cst_77 : f32 to vector<1x128xf32>
    %167 = arith.mulf %163, %166 : vector<1x128xf32>
    %168 = arith.mulf %165, %165 : vector<1x128xf32>
    %169 = arith.subf %167, %168 : vector<1x128xf32>
    %cst_78 = arith.constant 0.000000e+00 : f32
    %170 = vector.broadcast %cst_78 : f32 to vector<1x128xf32>
    %171 = arith.maximumf %169, %170 : vector<1x128xf32>
    %c5 = arith.constant 5 : index
    %c0_79 = arith.constant 0 : index
    %172 = vector.load %arg4[%c5, %c0_79] : memref<9x128xf32, #tpu.memory_space<vmem>>, vector<1x128xf32>
    %c5_80 = arith.constant 5 : index
    %c0_81 = arith.constant 0 : index
    %173 = vector.load %arg5[%c5_80, %c0_81] : memref<9x128xf32, #tpu.memory_space<vmem>>, vector<1x128xf32>
    %cst_82 = arith.constant 9.99999974E-6 : f32
    %174 = vector.broadcast %cst_82 : f32 to vector<1x128xf32>
    %175 = arith.addf %171, %174 : vector<1x128xf32>
    %176 = math.rsqrt %175 : vector<1x128xf32>
    %177 = arith.mulf %172, %176 : vector<1x128xf32>
    %178 = vector.broadcast %165 : vector<1x128xf32> to vector<16x128xf32>
    %179 = arith.subf %158, %178 : vector<16x128xf32>
    %180 = vector.broadcast %177 : vector<1x128xf32> to vector<16x128xf32>
    %181 = arith.mulf %179, %180 : vector<16x128xf32>
    %182 = vector.broadcast %173 : vector<1x128xf32> to vector<16x128xf32>
    %183 = arith.addf %181, %182 : vector<16x128xf32>
    %cst_83 = arith.constant 0.000000e+00 : f32
    %184 = vector.broadcast %cst_83 : f32 to vector<16x128xf32>
    %185 = arith.maximumf %183, %184 : vector<16x128xf32>
    %186 = arith.truncf %185 : vector<16x128xf32> to vector<16x128xbf16>
    %c5_84 = arith.constant 5 : index
    %c0_85 = arith.constant 0 : index
    %c0_86 = arith.constant 0 : index
    %187 = vector.load %arg2[%c5_84, %c0_85, %c0_86] : memref<8x128x128xbf16, #tpu.memory_space<vmem>>, vector<1x128x128xbf16>
    %188 = vector.shape_cast %187 : vector<1x128x128xbf16> to vector<128x128xbf16>
    %cst_87 = arith.constant dense<0.000000e+00> : vector<16x128xf32>
    %189 = tpu.matmul %186, %188, %cst_87 {dimension_numbers = #tpu.dot_dimension_numbers<[1], [0], [0], [1], [0, 0, 1, 1], [], []>} : vector<16x128xbf16>, vector<128x128xbf16>, vector<16x128xf32> -> vector<16x128xf32>
    %cst_88 = arith.constant dense<0.000000e+00> : vector<128xf32>
    %190 = vector.multi_reduction <add>, %189, %cst_88 [0] : vector<16x128xf32> to vector<128xf32>
    %191 = vector.shape_cast %190 : vector<128xf32> to vector<1x128xf32>
    %192 = arith.mulf %189, %189 : vector<16x128xf32>
    %cst_89 = arith.constant dense<0.000000e+00> : vector<128xf32>
    %193 = vector.multi_reduction <add>, %192, %cst_89 [0] : vector<16x128xf32> to vector<128xf32>
    %194 = vector.shape_cast %193 : vector<128xf32> to vector<1x128xf32>
    %cst_90 = arith.constant 6.250000e-02 : f32
    %195 = vector.broadcast %cst_90 : f32 to vector<1x128xf32>
    %196 = arith.mulf %191, %195 : vector<1x128xf32>
    %cst_91 = arith.constant 6.250000e-02 : f32
    %197 = vector.broadcast %cst_91 : f32 to vector<1x128xf32>
    %198 = arith.mulf %194, %197 : vector<1x128xf32>
    %199 = arith.mulf %196, %196 : vector<1x128xf32>
    %200 = arith.subf %198, %199 : vector<1x128xf32>
    %cst_92 = arith.constant 0.000000e+00 : f32
    %201 = vector.broadcast %cst_92 : f32 to vector<1x128xf32>
    %202 = arith.maximumf %200, %201 : vector<1x128xf32>
    %c6 = arith.constant 6 : index
    %c0_93 = arith.constant 0 : index
    %203 = vector.load %arg4[%c6, %c0_93] : memref<9x128xf32, #tpu.memory_space<vmem>>, vector<1x128xf32>
    %c6_94 = arith.constant 6 : index
    %c0_95 = arith.constant 0 : index
    %204 = vector.load %arg5[%c6_94, %c0_95] : memref<9x128xf32, #tpu.memory_space<vmem>>, vector<1x128xf32>
    %cst_96 = arith.constant 9.99999974E-6 : f32
    %205 = vector.broadcast %cst_96 : f32 to vector<1x128xf32>
    %206 = arith.addf %202, %205 : vector<1x128xf32>
    %207 = math.rsqrt %206 : vector<1x128xf32>
    %208 = arith.mulf %203, %207 : vector<1x128xf32>
    %209 = vector.broadcast %196 : vector<1x128xf32> to vector<16x128xf32>
    %210 = arith.subf %189, %209 : vector<16x128xf32>
    %211 = vector.broadcast %208 : vector<1x128xf32> to vector<16x128xf32>
    %212 = arith.mulf %210, %211 : vector<16x128xf32>
    %213 = vector.broadcast %204 : vector<1x128xf32> to vector<16x128xf32>
    %214 = arith.addf %212, %213 : vector<16x128xf32>
    %cst_97 = arith.constant 0.000000e+00 : f32
    %215 = vector.broadcast %cst_97 : f32 to vector<16x128xf32>
    %216 = arith.maximumf %214, %215 : vector<16x128xf32>
    %217 = arith.truncf %216 : vector<16x128xf32> to vector<16x128xbf16>
    %c6_98 = arith.constant 6 : index
    %c0_99 = arith.constant 0 : index
    %c0_100 = arith.constant 0 : index
    %218 = vector.load %arg2[%c6_98, %c0_99, %c0_100] : memref<8x128x128xbf16, #tpu.memory_space<vmem>>, vector<1x128x128xbf16>
    %219 = vector.shape_cast %218 : vector<1x128x128xbf16> to vector<128x128xbf16>
    %cst_101 = arith.constant dense<0.000000e+00> : vector<16x128xf32>
    %220 = tpu.matmul %217, %219, %cst_101 {dimension_numbers = #tpu.dot_dimension_numbers<[1], [0], [0], [1], [0, 0, 1, 1], [], []>} : vector<16x128xbf16>, vector<128x128xbf16>, vector<16x128xf32> -> vector<16x128xf32>
    %cst_102 = arith.constant dense<0.000000e+00> : vector<128xf32>
    %221 = vector.multi_reduction <add>, %220, %cst_102 [0] : vector<16x128xf32> to vector<128xf32>
    %222 = vector.shape_cast %221 : vector<128xf32> to vector<1x128xf32>
    %223 = arith.mulf %220, %220 : vector<16x128xf32>
    %cst_103 = arith.constant dense<0.000000e+00> : vector<128xf32>
    %224 = vector.multi_reduction <add>, %223, %cst_103 [0] : vector<16x128xf32> to vector<128xf32>
    %225 = vector.shape_cast %224 : vector<128xf32> to vector<1x128xf32>
    %cst_104 = arith.constant 6.250000e-02 : f32
    %226 = vector.broadcast %cst_104 : f32 to vector<1x128xf32>
    %227 = arith.mulf %222, %226 : vector<1x128xf32>
    %cst_105 = arith.constant 6.250000e-02 : f32
    %228 = vector.broadcast %cst_105 : f32 to vector<1x128xf32>
    %229 = arith.mulf %225, %228 : vector<1x128xf32>
    %230 = arith.mulf %227, %227 : vector<1x128xf32>
    %231 = arith.subf %229, %230 : vector<1x128xf32>
    %cst_106 = arith.constant 0.000000e+00 : f32
    %232 = vector.broadcast %cst_106 : f32 to vector<1x128xf32>
    %233 = arith.maximumf %231, %232 : vector<1x128xf32>
    %c7 = arith.constant 7 : index
    %c0_107 = arith.constant 0 : index
    %234 = vector.load %arg4[%c7, %c0_107] : memref<9x128xf32, #tpu.memory_space<vmem>>, vector<1x128xf32>
    %c7_108 = arith.constant 7 : index
    %c0_109 = arith.constant 0 : index
    %235 = vector.load %arg5[%c7_108, %c0_109] : memref<9x128xf32, #tpu.memory_space<vmem>>, vector<1x128xf32>
    %cst_110 = arith.constant 9.99999974E-6 : f32
    %236 = vector.broadcast %cst_110 : f32 to vector<1x128xf32>
    %237 = arith.addf %233, %236 : vector<1x128xf32>
    %238 = math.rsqrt %237 : vector<1x128xf32>
    %239 = arith.mulf %234, %238 : vector<1x128xf32>
    %240 = vector.broadcast %227 : vector<1x128xf32> to vector<16x128xf32>
    %241 = arith.subf %220, %240 : vector<16x128xf32>
    %242 = vector.broadcast %239 : vector<1x128xf32> to vector<16x128xf32>
    %243 = arith.mulf %241, %242 : vector<16x128xf32>
    %244 = vector.broadcast %235 : vector<1x128xf32> to vector<16x128xf32>
    %245 = arith.addf %243, %244 : vector<16x128xf32>
    %cst_111 = arith.constant 0.000000e+00 : f32
    %246 = vector.broadcast %cst_111 : f32 to vector<16x128xf32>
    %247 = arith.maximumf %245, %246 : vector<16x128xf32>
    %248 = arith.truncf %247 : vector<16x128xf32> to vector<16x128xbf16>
    %c7_112 = arith.constant 7 : index
    %c0_113 = arith.constant 0 : index
    %c0_114 = arith.constant 0 : index
    %249 = vector.load %arg2[%c7_112, %c0_113, %c0_114] : memref<8x128x128xbf16, #tpu.memory_space<vmem>>, vector<1x128x128xbf16>
    %250 = vector.shape_cast %249 : vector<1x128x128xbf16> to vector<128x128xbf16>
    %cst_115 = arith.constant dense<0.000000e+00> : vector<16x128xf32>
    %251 = tpu.matmul %248, %250, %cst_115 {dimension_numbers = #tpu.dot_dimension_numbers<[1], [0], [0], [1], [0, 0, 1, 1], [], []>} : vector<16x128xbf16>, vector<128x128xbf16>, vector<16x128xf32> -> vector<16x128xf32>
    %cst_116 = arith.constant dense<0.000000e+00> : vector<128xf32>
    %252 = vector.multi_reduction <add>, %251, %cst_116 [0] : vector<16x128xf32> to vector<128xf32>
    %253 = vector.shape_cast %252 : vector<128xf32> to vector<1x128xf32>
    %254 = arith.mulf %251, %251 : vector<16x128xf32>
    %cst_117 = arith.constant dense<0.000000e+00> : vector<128xf32>
    %255 = vector.multi_reduction <add>, %254, %cst_117 [0] : vector<16x128xf32> to vector<128xf32>
    %256 = vector.shape_cast %255 : vector<128xf32> to vector<1x128xf32>
    %cst_118 = arith.constant 6.250000e-02 : f32
    %257 = vector.broadcast %cst_118 : f32 to vector<1x128xf32>
    %258 = arith.mulf %253, %257 : vector<1x128xf32>
    %cst_119 = arith.constant 6.250000e-02 : f32
    %259 = vector.broadcast %cst_119 : f32 to vector<1x128xf32>
    %260 = arith.mulf %256, %259 : vector<1x128xf32>
    %261 = arith.mulf %258, %258 : vector<1x128xf32>
    %262 = arith.subf %260, %261 : vector<1x128xf32>
    %cst_120 = arith.constant 0.000000e+00 : f32
    %263 = vector.broadcast %cst_120 : f32 to vector<1x128xf32>
    %264 = arith.maximumf %262, %263 : vector<1x128xf32>
    %c8 = arith.constant 8 : index
    %c0_121 = arith.constant 0 : index
    %265 = vector.load %arg4[%c8, %c0_121] : memref<9x128xf32, #tpu.memory_space<vmem>>, vector<1x128xf32>
    %c8_122 = arith.constant 8 : index
    %c0_123 = arith.constant 0 : index
    %266 = vector.load %arg5[%c8_122, %c0_123] : memref<9x128xf32, #tpu.memory_space<vmem>>, vector<1x128xf32>
    %cst_124 = arith.constant 9.99999974E-6 : f32
    %267 = vector.broadcast %cst_124 : f32 to vector<1x128xf32>
    %268 = arith.addf %264, %267 : vector<1x128xf32>
    %269 = math.rsqrt %268 : vector<1x128xf32>
    %270 = arith.mulf %265, %269 : vector<1x128xf32>
    %271 = vector.broadcast %258 : vector<1x128xf32> to vector<16x128xf32>
    %272 = arith.subf %251, %271 : vector<16x128xf32>
    %273 = vector.broadcast %270 : vector<1x128xf32> to vector<16x128xf32>
    %274 = arith.mulf %272, %273 : vector<16x128xf32>
    %275 = vector.broadcast %266 : vector<1x128xf32> to vector<16x128xf32>
    %276 = arith.addf %274, %275 : vector<16x128xf32>
    %cst_125 = arith.constant 0.000000e+00 : f32
    %277 = vector.broadcast %cst_125 : f32 to vector<16x128xf32>
    %278 = arith.maximumf %276, %277 : vector<16x128xf32>
    %279 = arith.truncf %278 : vector<16x128xf32> to vector<16x128xbf16>
    %c0_126 = arith.constant 0 : index
    %c0_127 = arith.constant 0 : index
    %280 = vector.load %arg3[%c0_126, %c0_127] : memref<128x640xbf16, #tpu.memory_space<vmem>>, vector<128x640xbf16>
    %cst_128 = arith.constant dense<0.000000e+00> : vector<16x640xf32>
    %281 = tpu.matmul %279, %280, %cst_128 {dimension_numbers = #tpu.dot_dimension_numbers<[1], [0], [0], [1], [0, 0, 1, 1], [], []>} : vector<16x128xbf16>, vector<128x640xbf16>, vector<16x640xf32> -> vector<16x640xf32>
    %c0_129 = arith.constant 0 : index
    %c0_130 = arith.constant 0 : index
    %282 = vector.load %arg6[%c0_129, %c0_130] : memref<1x640xf32, #tpu.memory_space<vmem>>, vector<1x640xf32>
    %283 = vector.broadcast %282 : vector<1x640xf32> to vector<16x640xf32>
    %284 = arith.addf %281, %283 : vector<16x640xf32>
    %c0_131 = arith.constant 0 : index
    %c0_132 = arith.constant 0 : index
    %285 = vector.load %arg7[%c0_131, %c0_132] : memref<16x640xf32, #tpu.memory_space<vmem>>, vector<16x640xf32>
    tpu.vector_store %arg7[%c0_131, %c0_132], %284 {strides = array<i32>} : memref<16x640xf32, #tpu.memory_space<vmem>>, vector<16x640xf32>,
    return
  }
}

</mosaic_0001>

<bundles_post_ra>
// kernel: autoencoder_forward.1
= control target key start
LH: loop header
LB: loop body
LE: loop exit
PB: predicated region body
PF: predicated region fallthrough
CT: control target
= control target key end

     0   :  { %12 = vsyncpa [#allocation3], 0  ;;  %s2984_s0 = inlined_call_operand.hbm [shape: f32[16,640], index: 0, kind: input, shape index: {}]   ;;  %s2985_s1 = inlined_call_operand.hbm [shape: bf16[640,128], index: 1, kind: input, shape index: {}]   ;;  %s2986_s2 = inlined_call_operand.hbm [shape: bf16[8,128,128], index: 2, kind: input, shape index: {}]   ;;  %s2987_s3 = inlined_call_operand.hbm [shape: bf16[128,640], index: 3, kind: input, shape index: {}]   ;;  %s2988_s4 = inlined_call_operand.hbm [shape: f32[9,128], index: 4, kind: input, shape index: {}]   ;;  %s2989_s5 = inlined_call_operand.hbm [shape: f32[9,128], index: 5, kind: input, shape index: {}]   ;;  %s2990_s6 = inlined_call_operand.vmem [shape: f32[1,640], index: 6, kind: input, shape index: {}]   ;;  %s2991_s7 = inlined_call_operand.hbm [shape: f32[16,640], index: 7, kind: output, shape index: {}]  }
   0x1   :  { %13 = vsyncpa [#allocation6], 0 }
   0x2   :  { %14 = vsyncpa [#allocation9], 0 }
   0x3   :  { %15 = vsyncpa [#allocation12], 0  ;;  %s34_s26 = sshll.u32 %s2985_s1, 4  ;;  %s35_s26 = int_to_ptr.hbm [resolvable:$true] %s34_s26 }
   0x4   :  { %16 = vsyncpa [#allocation4], 0  ;;  %s2881_s27 = smov [#allocation5]   ;;  %s60_s8 = sshll.u32 %s2987_s3, 4  ;;  %s61_s8 = int_to_ptr.hbm [resolvable:$true] %s60_s8 }
   0x5   :  { %s36_s28 = sshll.u32 %s2881_s27, 4  ;;  %s2882_s9 = smov 64   ;;  %s37_s28 = int_to_ptr.vmem [resolvable:$true] %s36_s28 }
   0x6   :  { %s2883_s10 = smov 4   ;;  %s2884_s11 = smov [#allocation8]  }
   0x7   :  { %42 = dma.hbm_to_vmem [thread:$0]  %s35_s26, 5120, %s37_s28, [#allocation6], %s2882_s9, %s2882_s9, %s2883_s10  }
   0x8   :  { %s62_s12 = sshll.u32 %s2884_s11, 4  ;;  %s2885_s13 = smov 320   ;;  %s63_s12 = int_to_ptr.vmem [resolvable:$true] %s62_s12 }
   0x9   :  { %s2886_s14 = smov 20   ;;  %s21_s16 = sshll.u32 %s2984_s0, 4  ;;  %s22_s16 = int_to_ptr.hbm [resolvable:$true] %s21_s16 }
   0xa   :  { %68 = dma.hbm_to_vmem [thread:$0]  %s61_s8, 5120, %s63_s12, [#allocation9], %s2885_s13, %s2885_s13, %s2886_s14  }
   0xb   :  { %s2887_s17 = smov [#allocation2]   ;;  %s47_s20 = sshll.u32 %s2986_s2, 4  ;;  %s48_s20 = int_to_ptr.hbm [resolvable:$true] %s47_s20 }
   0xc   :  { %s23_s18 = sshll.u32 %s2887_s17, 4  ;;  %s2888_s21 = smov 640   ;;  %s24_s18 = int_to_ptr.vmem [resolvable:$true] %s23_s18 }
   0xd   :  { %s2889_s22 = smov 40   ;;  %s2890_s23 = smov [#allocation7]  }
   0xe   :  { %29 = dma.hbm_to_vmem [thread:$0]  %s22_s16, 1280, %s24_s18, [#allocation3], %s2888_s21, %s2888_s21, %s2889_s22  }
   0xf   :  { %s49_s24 = sshll.u32 %s2890_s23, 4  ;;  %s73_s0 = sshll.u32 %s2988_s4, 4  ;;  %s50_s24 = int_to_ptr.vmem [resolvable:$true] %s49_s24  ;;  %s74_s0 = int_to_ptr.hbm [resolvable:$true] %s73_s0 }
  0x10   :  { %55 = dma.hbm_to_vmem [thread:$0]  %s48_s20, 8192, %s50_s24, [#allocation6], %s2882_s9, %s2882_s9, %s2883_s10  }
  0x11   :  { %s2891_s27 = smov [#allocation10]   ;;  %s86_s30 = sshll.u32 %s2989_s5, 4  ;;  %s87_s30 = int_to_ptr.hbm [resolvable:$true] %s86_s30 }
  0x12   :  { %s75_s28 = sshll.u32 %s2891_s27, 4  ;;  %s2892_s8 = smov 128   ;;  %s76_s28 = int_to_ptr.vmem [resolvable:$true] %s75_s28 }
  0x13   :  { %s2893_s11 = smov 8   ;;  %s2894_s12 = smov [#allocation11]  }
  0x14   :  { %81 = dma.hbm_to_vmem [thread:$0]  %s74_s0, 256, %s76_s28, [#allocation9], %s2892_s8, %s2892_s8, %s2893_s11  }
  0x15   :  { %s88_s13 = sshll.u32 %s2894_s12, 4  ;;  %s89_s13 = int_to_ptr.vmem [resolvable:$true] %s88_s13 }
  0x16   :  { %94 = dma.hbm_to_vmem [thread:$0]  %s87_s30, 256, %s89_s13, [#allocation12], %s2892_s8, %s2892_s8, %s2893_s11  }
  0x17   :  { %2871 = dma.done.wait [#allocation3], 1280  }
  0x18   :  { %2872 = vsyncadd [#allocation3], 4294966016 }
  0x19   :  { %2873 = dma.done.wait [#allocation6], 13312  }
  0x1a   :  { %2874 = vsyncadd [#allocation6], 4294953984 }
  0x1b   :  { %2875 = dma.done.wait [#allocation9], 5376  }
  0x1c   :  { %2876 = vsyncadd [#allocation9], 4294961920 }
  0x1d   :  { %2877 = dma.done.wait [#allocation12], 256  }
  0x1e   :  { %2878 = vsyncadd [#allocation12], 4294967040  ;;  %v2524_v0 = vld [vmem:[#allocation5 + $0x38] sm:$0xff]  ;;  %v2523_v4 = vld [vmem:[#allocation5 + $0x30] sm:$0xff]  ;;  %s1925_s1 = sshll.u32 %s2991_s7, 4  ;;  %s1926_s1 = int_to_ptr.hbm [resolvable:$true] %s1925_s1 }
  0x1f   :  { %v2540_v1 = vld [vmem:[#allocation5 + $0xb8] sm:$0xff]  ;;  %456 = vmatpush.bf16.msra.mxu0 %v2524_v0  ;;  %v2539_v5 = vld [vmem:[#allocation5 + $0xb0] sm:$0xff]  ;;  %v2522_v8 = vld [vmem:[#allocation5 + $0x28] sm:$0xff] }
  0x20   :  { %v2548_v2 = vld [vmem:[#allocation5 + $0xf8] sm:$0xff]  ;;  %484 = vmatpush.bf16.msra.mxu2 %v2540_v1  ;;  %v2547_v6 = vld [vmem:[#allocation5 + $0xf0] sm:$0xff]  ;;  %v2538_v9 = vld [vmem:[#allocation5 + $0xa8] sm:$0xff] }
  0x21   :  { %v2532_v3 = vld [vmem:[#allocation5 + $0x78] sm:$0xff]  ;;  %498 = vmatpush.bf16.msra.mxu3 %v2548_v2  ;;  %v2531_v7 = vld [vmem:[#allocation5 + $0x70] sm:$0xff]  ;;  %v2546_v10 = vld [vmem:[#allocation5 + $0xe8] sm:$0xff] }
  0x22   :  { %470 = vmatpush.bf16.msra.mxu1 %v2532_v3  ;;  %v2530_v11 = vld [vmem:[#allocation5 + $0x68] sm:$0xff]  ;;  %v2521_v12 = vld [vmem:[#allocation5 + $0x20] sm:$0xff]  ;;  %v2520_v16 = vld [vmem:[#allocation5 + $0x18] sm:$0xff] }
  0x23   :  { %457 = vmatpush.bf16.msra.mxu0 %v2523_v4  ;;  %v2537_v13 = vld [vmem:[#allocation5 + $0xa0] sm:$0xff]  ;;  %v2536_v17 = vld [vmem:[#allocation5 + $0x98] sm:$0xff]  ;;  %v2519_v20 = vld [vmem:[#allocation5 + $0x10] sm:$0xff] }
  0x24   :  { %485 = vmatpush.bf16.msra.mxu2 %v2539_v5  ;;  %v2545_v14 = vld [vmem:[#allocation5 + $0xe0] sm:$0xff]  ;;  %v2544_v18 = vld [vmem:[#allocation5 + $0xd8] sm:$0xff]  ;;  %v2535_v21 = vld [vmem:[#allocation5 + $0x90] sm:$0xff] }
  0x25   :  { %499 = vmatpush.bf16.msra.mxu3 %v2547_v6  ;;  %v2529_v15 = vld [vmem:[#allocation5 + $0x60] sm:$0xff]  ;;  %v2528_v19 = vld [vmem:[#allocation5 + $0x58] sm:$0xff]  ;;  %v2543_v22 = vld [vmem:[#allocation5 + $0xd0] sm:$0xff] }
  0x26   :  { %471 = vmatpush.bf16.msra.mxu1 %v2531_v7  ;;  %v2527_v23 = vld [vmem:[#allocation5 + $0x50] sm:$0xff]  ;;  %v2518_v24 = vld [vmem:[#allocation5 + $0x8] sm:$0xff]  ;;  %v2517_v28 = vld [vmem:[#allocation5] sm:$0xff] }
  0x27   :  { %458 = vmatpush.bf16.msra.mxu0 %v2522_v8  ;;  %v2534_v25 = vld [vmem:[#allocation5 + $0x88] sm:$0xff]  ;;  %v2533_v29 = vld [vmem:[#allocation5 + $0x80] sm:$0xff]  ;;  %v2556_v30 = vld [vmem:[#allocation5 + $0x138] sm:$0xff] }
  0x28   :  { %486 = vmatpush.bf16.msra.mxu2 %v2538_v9  ;;  %v2542_v26 = vld [vmem:[#allocation5 + $0xc8] sm:$0xff]  ;;  %v123_v31 = vld [vmem:[#allocation2 + $0x10] sm:$0xff]  ;;  %v121_v33 = vld [vmem:[#allocation2] sm:$0xff] }
  0x29   :  { %500 = vmatpush.bf16.msra.mxu3 %v2546_v10  ;;  %v2526_v27 = vld [vmem:[#allocation5 + $0x48] sm:$0xff]  ;;  %v126_v34 = vld [vmem:[#allocation2 + $0x28] sm:$0xff]  ;;  %v2541_v35 = vld [vmem:[#allocation5 + $0xc0] sm:$0xff] }
  0x2a   :  { %472 = vmatpush.bf16.msra.mxu1 %v2530_v11  ;;  %v128_v32 = vld [vmem:[#allocation2 + $0x38] sm:$0xff]  ;;  %v129_v37 = vld [vmem:[#allocation2 + $0x40] sm:$0xff]  ;;  %v2525_v38 = vld [vmem:[#allocation5 + $0x40] sm:$0xff]  ;;  %v131_v42 = vpack.c.bf16 %v126_v34, %v121_v33 }
  0x2b   :  { %459 = vmatpush.bf16.msra.mxu0 %v2521_v12  ;;  %v124_v36 = vld [vmem:[#allocation2 + $0x18] sm:$0xff]  ;;  %v122_v39 = vld [vmem:[#allocation2 + $0x8] sm:$0xff]  ;;  %v127_v40 = vld [vmem:[#allocation2 + $0x30] sm:$0xff]  ;;  %v133_v41 = vpack.c.bf16 %v128_v32, %v123_v31 }
  0x2c   :  { %487 = vmatpush.bf16.msra.mxu2 %v2537_v13  ;;  %v134_v43 = vpack.c.bf16 %v129_v37, %v124_v36  ;;  %v2555_v44 = vld [vmem:[#allocation5 + $0x130] sm:$0xff]  ;;  %v132_v45 = vpack.c.bf16 %v127_v40, %v122_v39  ;;  %v2554_v46 = vld [vmem:[#allocation5 + $0x128] sm:$0xff]  ;;  %v2553_v47 = vld [vmem:[#allocation5 + $0x120] sm:$0xff] }
  0x2d   :  { %501 = vmatpush.bf16.msra.mxu3 %v2545_v14  ;;  %v2552_v48 = vld [vmem:[#allocation5 + $0x118] sm:$0xff]  ;;  %v2551_v49 = vld [vmem:[#allocation5 + $0x110] sm:$0xff]  ;;  %v2550_v50 = vld [vmem:[#allocation5 + $0x108] sm:$0xff] }
  0x2e   :  { %473 = vmatpush.bf16.msra.mxu1 %v2529_v15  ;;  %v2549_v51 = vld [vmem:[#allocation5 + $0x100] sm:$0xff]  ;;  %v125_v52 = vld [vmem:[#allocation2 + $0x20] sm:$0xff]  ;;  %v130_v53 = vld [vmem:[#allocation2 + $0x48] sm:$0xff] }
  0x2f   :  { %460 = vmatpush.bf16.msra.mxu0 %v2520_v16  ;;  %v135_v54 = vpack.c.bf16 %v130_v53, %v125_v52  ;;  %v2564_v1 = vld [vmem:[#allocation7 + $0x38] sm:$0xff]  ;;  %v2563_v5 = vld [vmem:[#allocation7 + $0x30] sm:$0xff]  ;;  %v2562_v10 = vld [vmem:[#allocation7 + $0x28] sm:$0xff] }
  0x30   :  { %488 = vmatpush.bf16.msra.mxu2 %v2536_v17  ;;  %v2561_v15 = vld [vmem:[#allocation7 + $0x20] sm:$0xff] }
  0x31   :  { %502 = vmatpush.bf16.msra.mxu3 %v2544_v18  ;;  %v2557_v33 = vld [vmem:[#allocation7] sm:$0xff] }
  0x32   :  { %474 = vmatpush.bf16.msra.mxu1 %v2528_v19 }
  0x33   :  { %461 = vmatpush.bf16.msra.mxu0 %v2519_v20  ;;  %v2560_v20 = vld [vmem:[#allocation7 + $0x18] sm:$0xff] }
  0x34   :  { %489 = vmatpush.bf16.msra.mxu2 %v2535_v21 }
  0x35   :  { %503 = vmatpush.bf16.msra.mxu3 %v2543_v22 }
  0x36   :  { %475 = vmatpush.bf16.msra.mxu1 %v2527_v23 }
  0x37   :  { %462 = vmatpush.bf16.msra.mxu0 %v2518_v24 }
  0x38   :  { %490 = vmatpush.bf16.msra.mxu2 %v2534_v25  ;;  %v2559_v25 = vld [vmem:[#allocation7 + $0x10] sm:$0xff] }
  0x39   :  { %504 = vmatpush.bf16.msra.mxu3 %v2542_v26 }
  0x3a   :  { %476 = vmatpush.bf16.msra.mxu1 %v2526_v27 }
  0x3b   :  { %463 = vmatpush.bf16.msra.mxu0 %v2517_v28 }
  0x3c   :  { %491 = vmatpush.bf16.msra.mxu2 %v2533_v29 }
  0x3d   :  { %505 = vmatpush.bf16.msra.mxu3 %v2541_v35 }
  0x3e   :  { %477 = vmatpush.bf16.msra.mxu1 %v2525_v38  ;;  %464 = vmatmul.bf16.vlgmr.msra.gmra.mxu0 %v131_v42 }
  0x3f   :  { %512 = vmatpush.bf16.msrb.mxu0 %v2556_v30  ;;  %492 = vmatmul.bf16.vlgmr.msra.gmra.mxu2 %v133_v41  ;;  %v2558_v30 = vld [vmem:[#allocation7 + $0x8] sm:$0xff] }
  0x40   :  { %506 = vmatmul.bf16.vlgmr.msra.gmra.mxu3 %v134_v43 }
  0x41   :  { %478 = vmatmul.bf16.vlgmr.msra.gmra.mxu1 %v132_v45 }
  0x42   :  { %636 = vmatpush.bf16.msrb.mxu1 %v2564_v1 }
  0x43   :  { %513 = vmatpush.bf16.msrb.mxu0 %v2555_v44  ;;  %v547_v44 = vld [vmem:[#allocation10] sm:$0x1] }
  0x46   :  { %637 = vmatpush.bf16.msrb.mxu1 %v2563_v5 }
  0x47   :  { %514 = vmatpush.bf16.msrb.mxu0 %v2554_v46 }
  0x4a   :  { %638 = vmatpush.bf16.msrb.mxu1 %v2562_v10 }
  0x4b   :  { %515 = vmatpush.bf16.msrb.mxu0 %v2553_v47 }
  0x4e   :  { %639 = vmatpush.bf16.msrb.mxu1 %v2561_v15 }
  0x4f   :  { %516 = vmatpush.bf16.msrb.mxu0 %v2552_v48 }
  0x52   :  { %640 = vmatpush.bf16.msrb.mxu1 %v2560_v20 }
  0x53   :  { %517 = vmatpush.bf16.msrb.mxu0 %v2551_v49 }
  0x56   :  { %641 = vmatpush.bf16.msrb.mxu1 %v2559_v25 }
  0x57   :  { %518 = vmatpush.bf16.msrb.mxu0 %v2550_v50 }
  0x5a   :  { %642 = vmatpush.bf16.msrb.mxu1 %v2558_v30 }
  0x5b   :  { %519 = vmatpush.bf16.msrb.mxu0 %v2549_v51  ;;  %v2676_v51 = vld [vmem:[#allocation11] ss:$0 sm:$0xff] }
  0x5e   :  { %520 = vmatmul.bf16.vlgmr.msrb.gmra.mxu0 %v135_v54  ;;  %643 = vmatpush.bf16.msrb.mxu1 %v2557_v33 }
  0xbb   :  { %v465_v55 = vpop.f32.mrf.mxu0 }
  0xbe   :  { %v479_v56 = vpop.f32.mrf.mxu1 }
  0xbf   :  { %v480_v61 = vadd.f32 %v479_v56, %v465_v55 }
  0xc2   :  { %v493_v57 = vpop.f32.mrf.mxu2 }
  0xc3   :  { %v467_v58 = vpop.f32.mrf.mxu0  ;;  %v507_v59 = vpop.f32.mrf.mxu3  ;;  %v494_v2 = vadd.f32 %v493_v57, %v480_v61  ;;  %v2571_v61 = vld [vmem:[#allocation7 + $0x70] sm:$0xff] }
  0xc5   :  { %v508_v6 = vadd.f32 %v507_v59, %v494_v2  ;;  %v2572_v59 = vld [vmem:[#allocation7 + $0x78] sm:$0xff] }
  0xc6   :  { %v481_v60 = vpop.f32.mrf.mxu1  ;;  %761 = vmatpush.bf16.msrb.mxu2 %v2572_v59 }
  0xc7   :  { %v482_v62 = vadd.f32 %v481_v60, %v467_v58 }
  0xca   :  { %v495_v63 = vpop.f32.mrf.mxu2  ;;  %762 = vmatpush.bf16.msrb.mxu2 %v2571_v61 }
  0xcb   :  { %v496_v3 = vadd.f32 %v495_v63, %v482_v62  ;;  %v509_v4 = vpop.f32.mrf.mxu3  ;;  %v2570_v62 = vld [vmem:[#allocation7 + $0x68] sm:$0xff] }
  0xcd   :  { %v510_v7 = vadd.f32 %v509_v4, %v496_v3  ;;  %v2569_v3 = vld [vmem:[#allocation7 + $0x60] sm:$0xff] }
  0xce   :  { %763 = vmatpush.bf16.msrb.mxu2 %v2570_v62 }
  0xd2   :  { %764 = vmatpush.bf16.msrb.mxu2 %v2569_v3 }
  0xdb   :  { %v521_v0 = vpop.f32.mrf.mxu0 }
  0xdc   :  { %v522_v8 = vadd.f32 %v521_v0, %v508_v6 }
  0xde   :  { %v533_v12 = vmul.f32 %v522_v8, %v522_v8 }
  0xe3   :  { %v523_v9 = vpop.f32.mrf.mxu0 }
  0xe4   :  { %v524_v11 = vadd.f32 %v523_v9, %v510_v7 }
  0xe6   :  { %v526_v13 = vadd.f32 %v524_v11, %v522_v8  ;;  %v534_v14 = vmul.f32 %v524_v11, %v524_v11 }
  0xe8   :  { %v527_v16 = vrot.slane %v526_v13, 4  ;;  %v535_v17 = vadd.f32 %v534_v14, %v533_v12 }
  0xea   :  { %v528_v18 = vadd.f32 %v527_v16, %v526_v13  ;;  %v536_v19 = vrot.slane %v535_v17, 4  ;;  %v2567_v13 = vld [vmem:[#allocation7 + $0x50] sm:$0xff] }
  0xec   :  { %v529_v21 = vrot.slane %v528_v18, 2  ;;  %v537_v22 = vadd.f32 %v536_v19, %v535_v17 }
  0xee   :  { %v530_v23 = vadd.f32 %v529_v21, %v528_v18  ;;  %v538_v24 = vrot.slane %v537_v22, 2  ;;  %v2566_v18 = vld [vmem:[#allocation7 + $0x48] sm:$0xff]  ;;  %v2565_v21 = vld [vmem:[#allocation7 + $0x40] sm:$0xff] }
  0xf0   :  { %v531_v26 = vrot.slane %v530_v23, 1  ;;  %v539_v27 = vadd.f32 %v538_v24, %v537_v22 }
  0xf2   :  { %v532_v28 = vadd.f32 %v531_v26, %v530_v23  ;;  %v540_v29 = vrot.slane %v539_v27, 1 }
  0xf4   :  { %v541_v31 = vadd.f32 %v540_v29, %v539_v27  ;;  %v542_v32 = vmul.f32 0.0625, %v532_v28 }
  0xf6   :  { %v543_v34 = vmul.f32 0.0625, %v541_v31  ;;  %v544_v35 = vmul.f32 %v542_v32, %v542_v32  ;;  %v562_v48 = vsub.f32 %v524_v11, %v542_v32  ;;  %v561_v50 = vsub.f32 %v522_v8, %v542_v32  ;;  %v2568_v8 = vld [vmem:[#allocation7 + $0x58] sm:$0xff]  ;;  %v671_v32 = vld [vmem:[#allocation10 + $0x1] sm:$0x1] }
  0xf7   :  { %765 = vmatpush.bf16.msrb.mxu2 %v2568_v8 }
  0xf8   :  { %v545_v36 = vsub.f32 %v543_v34, %v544_v35 }
  0xfa   :  { %v546_v37 = vmax.f32 %v545_v36, 0.0 }
  0xfb   :  { %766 = vmatpush.bf16.msrb.mxu2 %v2567_v13 }
  0xfc   :  { %v549_v38 = vadd.f32 1e-05, %v546_v37 }
  0xfe   :  { %2685 = vrsqrt.f32 %v549_v38  ;;  %vm556_vm1 = vweird.f32 %v549_v38 }
  0xff   :  { %767 = vmatpush.bf16.msrb.mxu2 %v2566_v18 }
 0x103   :  { %768 = vmatpush.bf16.msrb.mxu2 %v2565_v21 }
 0x104   :  { %v2686_v39 = vpop.eup %2685 }
 0x105   :  { %v551_v40 = vmul.f32 %v2686_v39, %v549_v38  ;;  %vm557_vm0 = vweird.f32 %v2686_v39 }
 0x106   :  { %vm558_vm2 = vmor %vm556_vm1, %vm557_vm0 }
 0x107   :  { %v552_v41 = vmul.f32 %v2686_v39, %v551_v40 }
 0x109   :  { %v553_v42 = vmul.f32 0.5, %v552_v41 }
 0x10b   :  { %v554_v43 = vsub.f32 1.5, %v553_v42 }
 0x10d   :  { %v555_v45 = vmul.f32 %v2686_v39, %v554_v43 }
 0x10f   :  { %v559_v46 = vsel %vm558_vm2, %v2686_v39, %v555_v45  ;;  %v2677_v39 = vld [vmem:[#allocation11 + $0x1] ss:$0 sm:$0xff] }
 0x110   :  { %v560_v47 = vmul.f32 %v559_v46, %v547_v44 }
 0x112   :  { %v563_v49 = vperm.slane %v560_v47, 0  ;;  %v2580_v47 = vld [vmem:[#allocation7 + $0xb8] sm:$0xff] }
 0x113   :  { %886 = vmatpush.bf16.msrb.mxu3 %v2580_v47 }
 0x114   :  { %v565_v52 = vmul.f32 %v563_v49, %v562_v48  ;;  %v564_v53 = vmul.f32 %v563_v49, %v561_v50  ;;  %v2579_v49 = vld [vmem:[#allocation7 + $0xb0] sm:$0xff]  ;;  %v2578_v50 = vld [vmem:[#allocation7 + $0xa8] sm:$0xff] }
 0x116   :  { %v567_v54 = vadd.f32 %v2676_v51, %v564_v53  ;;  %v568_v55 = vadd.f32 %v2676_v51, %v565_v52 }
 0x117   :  { %887 = vmatpush.bf16.msrb.mxu3 %v2579_v49 }
 0x118   :  { %v569_v56 = vmax.f32 %v567_v54, 0.0  ;;  %v570_v57 = vmax.f32 %v568_v55, 0.0  ;;  %v2577_v55 = vld [vmem:[#allocation7 + $0xa0] sm:$0xff] }
 0x11a   :  { %v571_v58 = vpack.c.bf16 %v570_v57, %v569_v56 }
 0x11b   :  { %888 = vmatpush.bf16.msrb.mxu3 %v2578_v50 }
 0x11c   :  { %644 = vmatmul.bf16.vlgmr.msrb.gmra.mxu1 %v571_v58 }
 0x11f   :  { %889 = vmatpush.bf16.msrb.mxu3 %v2577_v55 }
 0x199   :  { %v645_v60 = vpop.f32.mrf.mxu1 }
 0x19a   :  { %v657_v0 = vmul.f32 %v645_v60, %v645_v60 }
 0x1a1   :  { %v647_v63 = vpop.f32.mrf.mxu1 }
 0x1a2   :  { %v650_v1 = vadd.f32 %v647_v63, %v645_v60  ;;  %v658_v2 = vmul.f32 %v647_v63, %v647_v63 }
 0x1a4   :  { %v651_v4 = vrot.slane %v650_v1, 4  ;;  %v659_v5 = vadd.f32 %v658_v2, %v657_v0 }
 0x1a6   :  { %v652_v6 = vadd.f32 %v651_v4, %v650_v1  ;;  %v660_v7 = vrot.slane %v659_v5, 4  ;;  %v2575_v1 = vld [vmem:[#allocation7 + $0x90] sm:$0xff] }
 0x1a8   :  { %v653_v9 = vrot.slane %v652_v6, 2  ;;  %v661_v10 = vadd.f32 %v660_v7, %v659_v5 }
 0x1aa   :  { %v654_v11 = vadd.f32 %v653_v9, %v652_v6  ;;  %v662_v12 = vrot.slane %v661_v10, 2  ;;  %v2574_v6 = vld [vmem:[#allocation7 + $0x88] sm:$0xff]  ;;  %v2573_v9 = vld [vmem:[#allocation7 + $0x80] sm:$0xff] }
 0x1ac   :  { %v655_v14 = vrot.slane %v654_v11, 1  ;;  %v663_v15 = vadd.f32 %v662_v12, %v661_v10 }
 0x1ae   :  { %v656_v16 = vadd.f32 %v655_v14, %v654_v11  ;;  %v664_v17 = vrot.slane %v663_v15, 1 }
 0x1b0   :  { %v665_v19 = vadd.f32 %v664_v17, %v663_v15  ;;  %v666_v20 = vmul.f32 0.0625, %v656_v16 }
 0x1b2   :  { %v667_v22 = vmul.f32 0.0625, %v665_v19  ;;  %v668_v23 = vmul.f32 %v666_v20, %v666_v20  ;;  %v686_v36 = vsub.f32 %v647_v63, %v666_v20  ;;  %v685_v38 = vsub.f32 %v645_v60, %v666_v20  ;;  %v2576_v60 = vld [vmem:[#allocation7 + $0x98] sm:$0xff]  ;;  %v796_v20 = vld [vmem:[#allocation10 + $0x2] sm:$0x1] }
 0x1b3   :  { %890 = vmatpush.bf16.msrb.mxu3 %v2576_v60 }
 0x1b4   :  { %v669_v24 = vsub.f32 %v667_v22, %v668_v23 }
 0x1b6   :  { %v670_v25 = vmax.f32 %v669_v24, 0.0 }
 0x1b7   :  { %891 = vmatpush.bf16.msrb.mxu3 %v2575_v1 }
 0x1b8   :  { %v673_v26 = vadd.f32 1e-05, %v670_v25 }
 0x1ba   :  { %2687 = vrsqrt.f32 %v673_v26  ;;  %vm680_vm4 = vweird.f32 %v673_v26 }
 0x1bb   :  { %892 = vmatpush.bf16.msrb.mxu3 %v2574_v6 }
 0x1bf   :  { %893 = vmatpush.bf16.msrb.mxu3 %v2573_v9 }
 0x1c0   :  { %v2688_v27 = vpop.eup %2687 }
 0x1c1   :  { %v675_v28 = vmul.f32 %v2688_v27, %v673_v26  ;;  %vm681_vm3 = vweird.f32 %v2688_v27 }
 0x1c2   :  { %vm682_vm5 = vmor %vm680_vm4, %vm681_vm3 }
 0x1c3   :  { %v676_v29 = vmul.f32 %v2688_v27, %v675_v28 }
 0x1c5   :  { %v677_v30 = vmul.f32 0.5, %v676_v29 }
 0x1c7   :  { %v678_v31 = vsub.f32 1.5, %v677_v30 }
 0x1c9   :  { %v679_v33 = vmul.f32 %v2688_v27, %v678_v31 }
 0x1cb   :  { %v683_v34 = vsel %vm682_vm5, %v2688_v27, %v679_v33  ;;  %v2678_v27 = vld [vmem:[#allocation11 + $0x2] ss:$0 sm:$0xff] }
 0x1cc   :  { %v684_v35 = vmul.f32 %v683_v34, %v671_v32 }
 0x1ce   :  { %v687_v37 = vperm.slane %v684_v35, 0  ;;  %v2588_v35 = vld [vmem:[#allocation7 + $0xf8] sm:$0xff] }
 0x1cf   :  { %1011 = vmatpush.bf16.msra.mxu0 %v2588_v35 }
 0x1d0   :  { %v689_v40 = vmul.f32 %v687_v37, %v686_v36  ;;  %v688_v41 = vmul.f32 %v687_v37, %v685_v38  ;;  %v2587_v37 = vld [vmem:[#allocation7 + $0xf0] sm:$0xff]  ;;  %v2586_v38 = vld [vmem:[#allocation7 + $0xe8] sm:$0xff] }
 0x1d2   :  { %v691_v42 = vadd.f32 %v2677_v39, %v688_v41  ;;  %v692_v43 = vadd.f32 %v2677_v39, %v689_v40 }
 0x1d3   :  { %1012 = vmatpush.bf16.msra.mxu0 %v2587_v37 }
 0x1d4   :  { %v693_v44 = vmax.f32 %v691_v42, 0.0  ;;  %v694_v45 = vmax.f32 %v692_v43, 0.0  ;;  %v2585_v43 = vld [vmem:[#allocation7 + $0xe0] sm:$0xff] }
 0x1d6   :  { %v695_v46 = vpack.c.bf16 %v694_v45, %v693_v44 }
 0x1d7   :  { %1013 = vmatpush.bf16.msra.mxu0 %v2586_v38 }
 0x1d8   :  { %769 = vmatmul.bf16.vlgmr.msrb.gmra.mxu2 %v695_v46 }
 0x1db   :  { %1014 = vmatpush.bf16.msra.mxu0 %v2585_v43 }
 0x25b   :  { %v770_v48 = vpop.f32.mrf.mxu2 }
 0x25c   :  { %v782_v52 = vmul.f32 %v770_v48, %v770_v48 }
 0x263   :  { %v772_v51 = vpop.f32.mrf.mxu2 }
 0x264   :  { %v775_v53 = vadd.f32 %v772_v51, %v770_v48  ;;  %v783_v54 = vmul.f32 %v772_v51, %v772_v51 }
 0x266   :  { %v776_v56 = vrot.slane %v775_v53, 4  ;;  %v784_v57 = vadd.f32 %v783_v54, %v782_v52 }
 0x268   :  { %v777_v58 = vadd.f32 %v776_v56, %v775_v53  ;;  %v785_v59 = vrot.slane %v784_v57, 4  ;;  %v2583_v53 = vld [vmem:[#allocation7 + $0xd0] sm:$0xff] }
 0x26a   :  { %v778_v61 = vrot.slane %v777_v58, 2  ;;  %v786_v62 = vadd.f32 %v785_v59, %v784_v57 }
 0x26c   :  { %v779_v63 = vadd.f32 %v778_v61, %v777_v58  ;;  %v787_v0 = vrot.slane %v786_v62, 2  ;;  %v2582_v58 = vld [vmem:[#allocation7 + $0xc8] sm:$0xff] }
 0x26e   :  { %v780_v2 = vrot.slane %v779_v63, 1  ;;  %v788_v3 = vadd.f32 %v787_v0, %v786_v62 }
 0x270   :  { %v781_v4 = vadd.f32 %v780_v2, %v779_v63  ;;  %v789_v5 = vrot.slane %v788_v3, 1  ;;  %v2581_v63 = vld [vmem:[#allocation7 + $0xc0] sm:$0xff] }
 0x272   :  { %v790_v7 = vadd.f32 %v789_v5, %v788_v3  ;;  %v791_v8 = vmul.f32 0.0625, %v781_v4 }
 0x274   :  { %v792_v10 = vmul.f32 0.0625, %v790_v7  ;;  %v793_v11 = vmul.f32 %v791_v8, %v791_v8  ;;  %v811_v24 = vsub.f32 %v772_v51, %v791_v8  ;;  %v810_v26 = vsub.f32 %v770_v48, %v791_v8  ;;  %v2584_v48 = vld [vmem:[#allocation7 + $0xd8] sm:$0xff]  ;;  %v921_v8 = vld [vmem:[#allocation10 + $0x3] sm:$0x1] }
 0x275   :  { %1015 = vmatpush.bf16.msra.mxu0 %v2584_v48 }
 0x276   :  { %v794_v12 = vsub.f32 %v792_v10, %v793_v11 }
 0x278   :  { %v795_v13 = vmax.f32 %v794_v12, 0.0 }
 0x279   :  { %1016 = vmatpush.bf16.msra.mxu0 %v2583_v53 }
 0x27a   :  { %v798_v14 = vadd.f32 1e-05, %v795_v13 }
 0x27c   :  { %2689 = vrsqrt.f32 %v798_v14  ;;  %vm805_vm7 = vweird.f32 %v798_v14 }
 0x27d   :  { %1017 = vmatpush.bf16.msra.mxu0 %v2582_v58 }
 0x281   :  { %1018 = vmatpush.bf16.msra.mxu0 %v2581_v63 }
 0x282   :  { %v2690_v15 = vpop.eup %2689 }
 0x283   :  { %v800_v16 = vmul.f32 %v2690_v15, %v798_v14  ;;  %vm806_vm6 = vweird.f32 %v2690_v15 }
 0x284   :  { %vm807_vm8 = vmor %vm805_vm7, %vm806_vm6 }
 0x285   :  { %v801_v17 = vmul.f32 %v2690_v15, %v800_v16 }
 0x287   :  { %v802_v18 = vmul.f32 0.5, %v801_v17 }
 0x289   :  { %v803_v19 = vsub.f32 1.5, %v802_v18 }
 0x28b   :  { %v804_v21 = vmul.f32 %v2690_v15, %v803_v19 }
 0x28d   :  { %v808_v22 = vsel %vm807_vm8, %v2690_v15, %v804_v21  ;;  %v2679_v15 = vld [vmem:[#allocation11 + $0x3] ss:$0 sm:$0xff] }
 0x28e   :  { %v809_v23 = vmul.f32 %v808_v22, %v796_v20 }
 0x290   :  { %v812_v25 = vperm.slane %v809_v23, 0  ;;  %v2596_v23 = vld [vmem:[#allocation7 + $0x138] sm:$0xff] }
 0x291   :  { %1136 = vmatpush.bf16.msra.mxu1 %v2596_v23 }
 0x292   :  { %v814_v28 = vmul.f32 %v812_v25, %v811_v24  ;;  %v813_v29 = vmul.f32 %v812_v25, %v810_v26  ;;  %v2595_v25 = vld [vmem:[#allocation7 + $0x130] sm:$0xff]  ;;  %v2594_v26 = vld [vmem:[#allocation7 + $0x128] sm:$0xff] }
 0x294   :  { %v816_v30 = vadd.f32 %v2678_v27, %v813_v29  ;;  %v817_v31 = vadd.f32 %v2678_v27, %v814_v28 }
 0x295   :  { %1137 = vmatpush.bf16.msra.mxu1 %v2595_v25 }
 0x296   :  { %v818_v32 = vmax.f32 %v816_v30, 0.0  ;;  %v819_v33 = vmax.f32 %v817_v31, 0.0  ;;  %v2593_v31 = vld [vmem:[#allocation7 + $0x120] sm:$0xff] }
 0x298   :  { %v820_v34 = vpack.c.bf16 %v819_v33, %v818_v32 }
 0x299   :  { %1138 = vmatpush.bf16.msra.mxu1 %v2594_v26 }
 0x29a   :  { %894 = vmatmul.bf16.vlgmr.msrb.gmra.mxu3 %v820_v34 }
 0x29d   :  { %1139 = vmatpush.bf16.msra.mxu1 %v2593_v31 }
 0x31d   :  { %v895_v36 = vpop.f32.mrf.mxu3 }
 0x31e   :  { %v907_v40 = vmul.f32 %v895_v36, %v895_v36 }
 0x325   :  { %v897_v39 = vpop.f32.mrf.mxu3 }
 0x326   :  { %v900_v41 = vadd.f32 %v897_v39, %v895_v36  ;;  %v908_v42 = vmul.f32 %v897_v39, %v897_v39 }
 0x328   :  { %v901_v44 = vrot.slane %v900_v41, 4  ;;  %v909_v45 = vadd.f32 %v908_v42, %v907_v40 }
 0x32a   :  { %v902_v46 = vadd.f32 %v901_v44, %v900_v41  ;;  %v910_v47 = vrot.slane %v909_v45, 4  ;;  %v2591_v41 = vld [vmem:[#allocation7 + $0x110] sm:$0xff] }
 0x32c   :  { %v903_v49 = vrot.slane %v902_v46, 2  ;;  %v911_v50 = vadd.f32 %v910_v47, %v909_v45 }
 0x32e   :  { %v904_v51 = vadd.f32 %v903_v49, %v902_v46  ;;  %v912_v52 = vrot.slane %v911_v50, 2  ;;  %v2590_v46 = vld [vmem:[#allocation7 + $0x108] sm:$0xff] }
 0x330   :  { %v905_v54 = vrot.slane %v904_v51, 1  ;;  %v913_v55 = vadd.f32 %v912_v52, %v911_v50 }
 0x332   :  { %v906_v56 = vadd.f32 %v905_v54, %v904_v51  ;;  %v914_v57 = vrot.slane %v913_v55, 1  ;;  %v2589_v51 = vld [vmem:[#allocation7 + $0x100] sm:$0xff] }
 0x334   :  { %v915_v59 = vadd.f32 %v914_v57, %v913_v55  ;;  %v916_v60 = vmul.f32 0.0625, %v906_v56 }
 0x336   :  { %v917_v61 = vmul.f32 0.0625, %v915_v59  ;;  %v918_v62 = vmul.f32 %v916_v60, %v916_v60  ;;  %v935_v12 = vsub.f32 %v895_v36, %v916_v60  ;;  %v936_v13 = vsub.f32 %v897_v39, %v916_v60  ;;  %v2592_v36 = vld [vmem:[#allocation7 + $0x118] sm:$0xff]  ;;  %v1046_v60 = vld [vmem:[#allocation10 + $0x4] sm:$0x1] }
 0x337   :  { %1140 = vmatpush.bf16.msra.mxu1 %v2592_v36 }
 0x338   :  { %v919_v0 = vsub.f32 %v917_v61, %v918_v62 }
 0x33a   :  { %v920_v1 = vmax.f32 %v919_v0, 0.0 }
 0x33b   :  { %1141 = vmatpush.bf16.msra.mxu1 %v2591_v41 }
 0x33c   :  { %v923_v2 = vadd.f32 1e-05, %v920_v1 }
 0x33e   :  { %2691 = vrsqrt.f32 %v923_v2  ;;  %vm930_vm10 = vweird.f32 %v923_v2 }
 0x33f   :  { %1142 = vmatpush.bf16.msra.mxu1 %v2590_v46 }
 0x343   :  { %1143 = vmatpush.bf16.msra.mxu1 %v2589_v51 }
 0x344   :  { %v2692_v3 = vpop.eup %2691 }
 0x345   :  { %v925_v4 = vmul.f32 %v2692_v3, %v923_v2  ;;  %vm931_vm9 = vweird.f32 %v2692_v3 }
 0x346   :  { %vm932_vm11 = vmor %vm930_vm10, %vm931_vm9 }
 0x347   :  { %v926_v5 = vmul.f32 %v2692_v3, %v925_v4 }
 0x349   :  { %v927_v6 = vmul.f32 0.5, %v926_v5 }
 0x34b   :  { %v928_v7 = vsub.f32 1.5, %v927_v6 }
 0x34d   :  { %v929_v9 = vmul.f32 %v2692_v3, %v928_v7 }
 0x34f   :  { %v933_v10 = vsel %vm932_vm11, %v2692_v3, %v929_v9  ;;  %v2680_v3 = vld [vmem:[#allocation11 + $0x4] ss:$0 sm:$0xff] }
 0x350   :  { %v934_v11 = vmul.f32 %v933_v10, %v921_v8 }
 0x352   :  { %v937_v14 = vperm.slane %v934_v11, 0  ;;  %v2604_v11 = vld [vmem:[#allocation7 + $0x178] sm:$0xff] }
 0x353   :  { %1261 = vmatpush.bf16.msra.mxu2 %v2604_v11 }
 0x354   :  { %v938_v16 = vmul.f32 %v937_v14, %v935_v12  ;;  %v939_v17 = vmul.f32 %v937_v14, %v936_v13  ;;  %v2603_v13 = vld [vmem:[#allocation7 + $0x170] sm:$0xff]  ;;  %v2602_v14 = vld [vmem:[#allocation7 + $0x168] sm:$0xff] }
 0x356   :  { %v942_v18 = vadd.f32 %v2679_v15, %v939_v17  ;;  %v941_v19 = vadd.f32 %v2679_v15, %v938_v16 }
 0x357   :  { %1262 = vmatpush.bf16.msra.mxu2 %v2603_v13 }
 0x358   :  { %v944_v20 = vmax.f32 %v942_v18, 0.0  ;;  %v943_v21 = vmax.f32 %v941_v19, 0.0  ;;  %v2601_v19 = vld [vmem:[#allocation7 + $0x160] sm:$0xff] }
 0x35a   :  { %v945_v22 = vpack.c.bf16 %v944_v20, %v943_v21 }
 0x35b   :  { %1263 = vmatpush.bf16.msra.mxu2 %v2602_v14 }
 0x35c   :  { %1019 = vmatmul.bf16.vlgmr.msra.gmra.mxu0 %v945_v22 }
 0x35f   :  { %1264 = vmatpush.bf16.msra.mxu2 %v2601_v19 }
 0x3d9   :  { %v1020_v24 = vpop.f32.mrf.mxu0 }
 0x3da   :  { %v1032_v28 = vmul.f32 %v1020_v24, %v1020_v24 }
 0x3e1   :  { %v1022_v27 = vpop.f32.mrf.mxu0 }
 0x3e2   :  { %v1025_v29 = vadd.f32 %v1022_v27, %v1020_v24  ;;  %v1033_v30 = vmul.f32 %v1022_v27, %v1022_v27 }
 0x3e4   :  { %v1026_v32 = vrot.slane %v1025_v29, 4  ;;  %v1034_v33 = vadd.f32 %v1033_v30, %v1032_v28 }
 0x3e6   :  { %v1027_v34 = vadd.f32 %v1026_v32, %v1025_v29  ;;  %v1035_v35 = vrot.slane %v1034_v33, 4  ;;  %v2599_v29 = vld [vmem:[#allocation7 + $0x150] sm:$0xff] }
 0x3e8   :  { %v1028_v37 = vrot.slane %v1027_v34, 2  ;;  %v1036_v38 = vadd.f32 %v1035_v35, %v1034_v33 }
 0x3ea   :  { %v1029_v39 = vadd.f32 %v1028_v37, %v1027_v34  ;;  %v1037_v40 = vrot.slane %v1036_v38, 2  ;;  %v2598_v34 = vld [vmem:[#allocation7 + $0x148] sm:$0xff] }
 0x3ec   :  { %v1030_v42 = vrot.slane %v1029_v39, 1  ;;  %v1038_v43 = vadd.f32 %v1037_v40, %v1036_v38 }
 0x3ee   :  { %v1031_v44 = vadd.f32 %v1030_v42, %v1029_v39  ;;  %v1039_v45 = vrot.slane %v1038_v43, 1  ;;  %v2597_v39 = vld [vmem:[#allocation7 + $0x140] sm:$0xff] }
 0x3f0   :  { %v1040_v47 = vadd.f32 %v1039_v45, %v1038_v43  ;;  %v1041_v48 = vmul.f32 0.0625, %v1031_v44 }
 0x3f2   :  { %v1042_v49 = vmul.f32 0.0625, %v1040_v47  ;;  %v1043_v50 = vmul.f32 %v1041_v48, %v1041_v48  ;;  %v1060_v0 = vsub.f32 %v1020_v24, %v1041_v48  ;;  %v1061_v1 = vsub.f32 %v1022_v27, %v1041_v48  ;;  %v2600_v24 = vld [vmem:[#allocation7 + $0x158] sm:$0xff]  ;;  %v1171_v48 = vld [vmem:[#allocation10 + $0x5] sm:$0x1] }
 0x3f3   :  { %1265 = vmatpush.bf16.msra.mxu2 %v2600_v24 }
 0x3f4   :  { %v1044_v52 = vsub.f32 %v1042_v49, %v1043_v50 }
 0x3f6   :  { %v1045_v53 = vmax.f32 %v1044_v52, 0.0 }
 0x3f7   :  { %1266 = vmatpush.bf16.msra.mxu2 %v2599_v29 }
 0x3f8   :  { %v1048_v54 = vadd.f32 1e-05, %v1045_v53 }
 0x3fa   :  { %2693 = vrsqrt.f32 %v1048_v54  ;;  %vm1055_vm13 = vweird.f32 %v1048_v54 }
 0x3fb   :  { %1267 = vmatpush.bf16.msra.mxu2 %v2598_v34 }
 0x3ff   :  { %1268 = vmatpush.bf16.msra.mxu2 %v2597_v39 }
 0x400   :  { %v2694_v55 = vpop.eup %2693 }
 0x401   :  { %v1050_v56 = vmul.f32 %v2694_v55, %v1048_v54  ;;  %vm1056_vm12 = vweird.f32 %v2694_v55 }
 0x402   :  { %vm1057_vm14 = vmor %vm1055_vm13, %vm1056_vm12 }
 0x403   :  { %v1051_v57 = vmul.f32 %v2694_v55, %v1050_v56 }
 0x405   :  { %v1052_v58 = vmul.f32 0.5, %v1051_v57 }
 0x407   :  { %v1053_v59 = vsub.f32 1.5, %v1052_v58 }
 0x409   :  { %v1054_v61 = vmul.f32 %v2694_v55, %v1053_v59 }
 0x40b   :  { %v1058_v62 = vsel %vm1057_vm14, %v2694_v55, %v1054_v61  ;;  %v2681_v55 = vld [vmem:[#allocation11 + $0x5] ss:$0 sm:$0xff] }
 0x40c   :  { %v1059_v63 = vmul.f32 %v1058_v62, %v1046_v60 }
 0x40e   :  { %v1062_v2 = vperm.slane %v1059_v63, 0  ;;  %v2612_v63 = vld [vmem:[#allocation7 + $0x1b8] sm:$0xff] }
 0x40f   :  { %1386 = vmatpush.bf16.msra.mxu3 %v2612_v63 }
 0x410   :  { %v1063_v4 = vmul.f32 %v1062_v2, %v1060_v0  ;;  %v1064_v5 = vmul.f32 %v1062_v2, %v1061_v1  ;;  %v2611_v1 = vld [vmem:[#allocation7 + $0x1b0] sm:$0xff]  ;;  %v2610_v2 = vld [vmem:[#allocation7 + $0x1a8] sm:$0xff] }
 0x412   :  { %v1067_v6 = vadd.f32 %v2680_v3, %v1064_v5  ;;  %v1066_v7 = vadd.f32 %v2680_v3, %v1063_v4 }
 0x413   :  { %1387 = vmatpush.bf16.msra.mxu3 %v2611_v1 }
 0x414   :  { %v1069_v8 = vmax.f32 %v1067_v6, 0.0  ;;  %v1068_v9 = vmax.f32 %v1066_v7, 0.0  ;;  %v2609_v7 = vld [vmem:[#allocation7 + $0x1a0] sm:$0xff] }
 0x416   :  { %v1070_v10 = vpack.c.bf16 %v1069_v8, %v1068_v9 }
 0x417   :  { %1388 = vmatpush.bf16.msra.mxu3 %v2610_v2 }
 0x418   :  { %1144 = vmatmul.bf16.vlgmr.msra.gmra.mxu1 %v1070_v10 }
 0x41b   :  { %1389 = vmatpush.bf16.msra.mxu3 %v2609_v7 }
 0x495   :  { %v1145_v12 = vpop.f32.mrf.mxu1 }
 0x496   :  { %v1157_v16 = vmul.f32 %v1145_v12, %v1145_v12 }
 0x49d   :  { %v1147_v15 = vpop.f32.mrf.mxu1 }
 0x49e   :  { %v1150_v17 = vadd.f32 %v1147_v15, %v1145_v12  ;;  %v1158_v18 = vmul.f32 %v1147_v15, %v1147_v15 }
 0x4a0   :  { %v1151_v20 = vrot.slane %v1150_v17, 4  ;;  %v1159_v21 = vadd.f32 %v1158_v18, %v1157_v16 }
 0x4a2   :  { %v1152_v22 = vadd.f32 %v1151_v20, %v1150_v17  ;;  %v1160_v23 = vrot.slane %v1159_v21, 4  ;;  %v2607_v17 = vld [vmem:[#allocation7 + $0x190] sm:$0xff] }
 0x4a4   :  { %v1153_v25 = vrot.slane %v1152_v22, 2  ;;  %v1161_v26 = vadd.f32 %v1160_v23, %v1159_v21 }
 0x4a6   :  { %v1154_v27 = vadd.f32 %v1153_v25, %v1152_v22  ;;  %v1162_v28 = vrot.slane %v1161_v26, 2  ;;  %v2606_v22 = vld [vmem:[#allocation7 + $0x188] sm:$0xff] }
 0x4a8   :  { %v1155_v30 = vrot.slane %v1154_v27, 1  ;;  %v1163_v31 = vadd.f32 %v1162_v28, %v1161_v26 }
 0x4aa   :  { %v1156_v32 = vadd.f32 %v1155_v30, %v1154_v27  ;;  %v1164_v33 = vrot.slane %v1163_v31, 1  ;;  %v2605_v27 = vld [vmem:[#allocation7 + $0x180] sm:$0xff] }
 0x4ac   :  { %v1165_v35 = vadd.f32 %v1164_v33, %v1163_v31  ;;  %v1166_v36 = vmul.f32 0.0625, %v1156_v32 }
 0x4ae   :  { %v1167_v37 = vmul.f32 0.0625, %v1165_v35  ;;  %v1168_v38 = vmul.f32 %v1166_v36, %v1166_v36  ;;  %v1185_v52 = vsub.f32 %v1145_v12, %v1166_v36  ;;  %v1186_v53 = vsub.f32 %v1147_v15, %v1166_v36  ;;  %v2608_v12 = vld [vmem:[#allocation7 + $0x198] sm:$0xff]  ;;  %v1296_v36 = vld [vmem:[#allocation10 + $0x6] sm:$0x1] }
 0x4af   :  { %1390 = vmatpush.bf16.msra.mxu3 %v2608_v12 }
 0x4b0   :  { %v1169_v40 = vsub.f32 %v1167_v37, %v1168_v38 }
 0x4b2   :  { %v1170_v41 = vmax.f32 %v1169_v40, 0.0 }
 0x4b3   :  { %1391 = vmatpush.bf16.msra.mxu3 %v2607_v17 }
 0x4b4   :  { %v1173_v42 = vadd.f32 1e-05, %v1170_v41 }
 0x4b6   :  { %2695 = vrsqrt.f32 %v1173_v42  ;;  %vm1180_vm0 = vweird.f32 %v1173_v42 }
 0x4b7   :  { %1392 = vmatpush.bf16.msra.mxu3 %v2606_v22 }
 0x4bb   :  { %1393 = vmatpush.bf16.msra.mxu3 %v2605_v27 }
 0x4bc   :  { %v2696_v43 = vpop.eup %2695 }
 0x4bd   :  { %v1175_v44 = vmul.f32 %v2696_v43, %v1173_v42  ;;  %vm1181_vm15 = vweird.f32 %v2696_v43 }
 0x4be   :  { %vm1182_vm1 = vmor %vm1180_vm0, %vm1181_vm15 }
 0x4bf   :  { %v1176_v45 = vmul.f32 %v2696_v43, %v1175_v44 }
 0x4c1   :  { %v1177_v46 = vmul.f32 0.5, %v1176_v45 }
 0x4c3   :  { %v1178_v47 = vsub.f32 1.5, %v1177_v46 }
 0x4c5   :  { %v1179_v49 = vmul.f32 %v2696_v43, %v1178_v47 }
 0x4c7   :  { %v1183_v50 = vsel %vm1182_vm1, %v2696_v43, %v1179_v49  ;;  %v2682_v43 = vld [vmem:[#allocation11 + $0x6] ss:$0 sm:$0xff] }
 0x4c8   :  { %v1184_v51 = vmul.f32 %v1183_v50, %v1171_v48 }
 0x4ca   :  { %v1187_v54 = vperm.slane %v1184_v51, 0  ;;  %v2620_v51 = vld [vmem:[#allocation7 + $0x1f8] sm:$0xff] }
 0x4cb   :  { %1511 = vmatpush.bf16.msrb.mxu0 %v2620_v51  ;;  %v2656_v51 = vld [vmem:[#allocation8 + $0x11c] sm:$0xf] }
 0x4cc   :  { %v1188_v56 = vmul.f32 %v1187_v54, %v1185_v52  ;;  %v1189_v57 = vmul.f32 %v1187_v54, %v1186_v53  ;;  %v2619_v53 = vld [vmem:[#allocation7 + $0x1f0] sm:$0xff]  ;;  %v2618_v54 = vld [vmem:[#allocation7 + $0x1e8] sm:$0xff] }
 0x4ce   :  { %v1192_v58 = vadd.f32 %v2681_v55, %v1189_v57  ;;  %v1191_v59 = vadd.f32 %v2681_v55, %v1188_v56 }
 0x4cf   :  { %1512 = vmatpush.bf16.msrb.mxu0 %v2619_v53 }
 0x4d0   :  { %v1194_v60 = vmax.f32 %v1192_v58, 0.0  ;;  %v1193_v61 = vmax.f32 %v1191_v59, 0.0  ;;  %v2617_v59 = vld [vmem:[#allocation7 + $0x1e0] sm:$0xff] }
 0x4d2   :  { %v1195_v62 = vpack.c.bf16 %v1194_v60, %v1193_v61 }
 0x4d3   :  { %1513 = vmatpush.bf16.msrb.mxu0 %v2618_v54  ;;  %v2507_v54 = vld [vmem:[#allocation8 + $0x120] sm:$0xf] }
 0x4d4   :  { %1269 = vmatmul.bf16.vlgmr.msra.gmra.mxu2 %v1195_v62 }
 0x4d7   :  { %1514 = vmatpush.bf16.msrb.mxu0 %v2617_v59 }
 0x557   :  { %v1270_v0 = vpop.f32.mrf.mxu2 }
 0x558   :  { %v1282_v4 = vmul.f32 %v1270_v0, %v1270_v0 }
 0x55f   :  { %v1272_v3 = vpop.f32.mrf.mxu2 }
 0x560   :  { %v1275_v5 = vadd.f32 %v1272_v3, %v1270_v0  ;;  %v1283_v6 = vmul.f32 %v1272_v3, %v1272_v3 }
 0x562   :  { %v1276_v8 = vrot.slane %v1275_v5, 4  ;;  %v1284_v9 = vadd.f32 %v1283_v6, %v1282_v4 }
 0x564   :  { %v1277_v10 = vadd.f32 %v1276_v8, %v1275_v5  ;;  %v1285_v11 = vrot.slane %v1284_v9, 4  ;;  %v2615_v5 = vld [vmem:[#allocation7 + $0x1d0] sm:$0xff] }
 0x566   :  { %v1278_v13 = vrot.slane %v1277_v10, 2  ;;  %v1286_v14 = vadd.f32 %v1285_v11, %v1284_v9 }
 0x568   :  { %v1279_v15 = vadd.f32 %v1278_v13, %v1277_v10  ;;  %v1287_v16 = vrot.slane %v1286_v14, 2  ;;  %v2614_v10 = vld [vmem:[#allocation7 + $0x1c8] sm:$0xff] }
 0x56a   :  { %v1280_v18 = vrot.slane %v1279_v15, 1  ;;  %v1288_v19 = vadd.f32 %v1287_v16, %v1286_v14 }
 0x56c   :  { %v1281_v20 = vadd.f32 %v1280_v18, %v1279_v15  ;;  %v1289_v21 = vrot.slane %v1288_v19, 1  ;;  %v2613_v15 = vld [vmem:[#allocation7 + $0x1c0] sm:$0xff] }
 0x56e   :  { %v1290_v23 = vadd.f32 %v1289_v21, %v1288_v19  ;;  %v1291_v24 = vmul.f32 0.0625, %v1281_v20 }
 0x570   :  { %v1292_v25 = vmul.f32 0.0625, %v1290_v23  ;;  %v1293_v26 = vmul.f32 %v1291_v24, %v1291_v24  ;;  %v1310_v40 = vsub.f32 %v1270_v0, %v1291_v24  ;;  %v1311_v41 = vsub.f32 %v1272_v3, %v1291_v24  ;;  %v2616_v0 = vld [vmem:[#allocation7 + $0x1d8] sm:$0xff]  ;;  %v1421_v24 = vld [vmem:[#allocation10 + $0x7] sm:$0x1] }
 0x571   :  { %1515 = vmatpush.bf16.msrb.mxu0 %v2616_v0  ;;  %v2651_v0 = vld [vmem:[#allocation8 + $0xf4] sm:$0xf] }
 0x572   :  { %v1294_v28 = vsub.f32 %v1292_v25, %v1293_v26 }
 0x574   :  { %v1295_v29 = vmax.f32 %v1294_v28, 0.0 }
 0x575   :  { %1516 = vmatpush.bf16.msrb.mxu0 %v2615_v5  ;;  %v2652_v5 = vld [vmem:[#allocation8 + $0xfc] sm:$0xf] }
 0x576   :  { %v1298_v30 = vadd.f32 1e-05, %v1295_v29 }
 0x578   :  { %2697 = vrsqrt.f32 %v1298_v30  ;;  %vm1305_vm3 = vweird.f32 %v1298_v30 }
 0x579   :  { %1517 = vmatpush.bf16.msrb.mxu0 %v2614_v10  ;;  %v2633_v10 = vld [vmem:[#allocation8 + $0x60] sm:$0xf0] }
 0x57d   :  { %1518 = vmatpush.bf16.msrb.mxu0 %v2613_v15 }
 0x57e   :  { %v2698_v31 = vpop.eup %2697 }
 0x57f   :  { %v1300_v32 = vmul.f32 %v2698_v31, %v1298_v30  ;;  %vm1306_vm2 = vweird.f32 %v2698_v31 }
 0x580   :  { %vm1307_vm4 = vmor %vm1305_vm3, %vm1306_vm2 }
 0x581   :  { %v1301_v33 = vmul.f32 %v2698_v31, %v1300_v32 }
 0x583   :  { %v1302_v34 = vmul.f32 0.5, %v1301_v33 }
 0x585   :  { %v1303_v35 = vsub.f32 1.5, %v1302_v34 }
 0x587   :  { %v1304_v37 = vmul.f32 %v2698_v31, %v1303_v35 }
 0x589   :  { %v1308_v38 = vsel %vm1307_vm4, %v2698_v31, %v1304_v37  ;;  %v2683_v31 = vld [vmem:[#allocation11 + $0x7] ss:$0 sm:$0xff] }
 0x58a   :  { %v1309_v39 = vmul.f32 %v1308_v38, %v1296_v36 }
 0x58c   :  { %v1312_v42 = vperm.slane %v1309_v39, 0  ;;  %v2499_v39 = vld [vmem:[#allocation8 + $0x118] sm:$0xf] }
 0x58e   :  { %v1313_v44 = vmul.f32 %v1312_v42, %v1310_v40  ;;  %v1314_v45 = vmul.f32 %v1312_v42, %v1311_v41  ;;  %v2658_v40 = vld [vmem:[#allocation8 + $0x128] sm:$0xf0]  ;;  %v2479_v42 = vld [vmem:[#allocation8 + $0xf0] sm:$0xf] }
 0x58f   :  { %v2500_v41 = vor.u32 %v2658_v40, %v2499_v39  ;;  %v2359_v39 = vld [vmem:[#allocation8] sm:$0xf]  ;;  %v2623_v40 = vld [vmem:[#allocation8 + $0x10] sm:$0xf0] }
 0x590   :  { %v1317_v46 = vadd.f32 %v2682_v43, %v1314_v45  ;;  %v1316_v47 = vadd.f32 %v2682_v43, %v1313_v44  ;;  %v2653_v43 = vld [vmem:[#allocation8 + $0x100] sm:$0xf0]  ;;  %v2459_v45 = vld [vmem:[#allocation8 + $0xc8] sm:$0xf] }
 0x591   :  { %1839 = vmatpush.bf16.msrb.mxu1 %v2500_v41  ;;  %v2480_v44 = vor.u32 %v2653_v43, %v2479_v42  ;;  %v2360_v43 = vor.u32 %v2623_v40, %v2359_v39  ;;  %v2455_v39 = vld [vmem:[#allocation8 + $0xb0] sm:$0xf]  ;;  %v2645_v40 = vld [vmem:[#allocation8 + $0xc0] sm:$0xf0] }
 0x592   :  { %v1319_v48 = vmax.f32 %v1317_v46, 0.0  ;;  %v1318_v49 = vmax.f32 %v1316_v47, 0.0  ;;  %v2648_v46 = vld [vmem:[#allocation8 + $0xd8] sm:$0xf0] }
 0x593   :  { %v2460_v47 = vor.u32 %v2648_v46, %v2459_v45  ;;  %v2421_v45 = vld [vmem:[#allocation8 + $0x8c] sm:$0xf0] }
 0x594   :  { %v1320_v50 = vpack.c.bf16 %v1319_v48, %v1318_v49  ;;  %v2439_v48 = vld [vmem:[#allocation8 + $0xa0] sm:$0xf]  ;;  %v2643_v49 = vld [vmem:[#allocation8 + $0xb0] sm:$0xf0] }
 0x595   :  { %1840 = vmatpush.bf16.msrb.mxu1 %v2480_v44  ;;  %v2636_v44 = vld [vmem:[#allocation8 + $0x7c] sm:$0xf] }
 0x596   :  { %1394 = vmatmul.bf16.vlgmr.msra.gmra.mxu3 %v1320_v50  ;;  %v2440_v50 = vor.u32 %v2643_v49, %v2439_v48  ;;  %v2424_v46 = vor.u32 %v2636_v44, %v2421_v45  ;;  %v2639_v48 = vld [vmem:[#allocation8 + $0x90] sm:$0xf0]  ;;  %v2637_v49 = vld [vmem:[#allocation8 + $0x84] sm:$0xf]  ;;  %v2435_v44 = vld [vmem:[#allocation8 + $0x88] sm:$0xf] }
 0x597   :  { %v2640_v45 = vld [vmem:[#allocation8 + $0x98] sm:$0xf0] }
 0x599   :  { %1841 = vmatpush.bf16.msrb.mxu1 %v2460_v47  ;;  %v2427_v47 = vld [vmem:[#allocation8 + $0x80] sm:$0xf] }
 0x59d   :  { %1842 = vmatpush.bf16.msrb.mxu1 %v2440_v50 }
 0x619   :  { %v1395_v52 = vpop.f32.mrf.mxu3 }
 0x61a   :  { %v1407_v56 = vmul.f32 %v1395_v52, %v1395_v52 }
 0x621   :  { %v1397_v55 = vpop.f32.mrf.mxu3 }
 0x622   :  { %v1400_v57 = vadd.f32 %v1397_v55, %v1395_v52  ;;  %v1408_v58 = vmul.f32 %v1397_v55, %v1397_v55 }
 0x624   :  { %v1401_v60 = vrot.slane %v1400_v57, 4  ;;  %v1409_v61 = vadd.f32 %v1408_v58, %v1407_v56  ;;  %v2657_v56 = vld [vmem:[#allocation8 + $0x124] sm:$0xf]  ;;  %v2509_v58 = vld [vmem:[#allocation8 + $0x134] sm:$0xf0] }
 0x626   :  { %v1402_v62 = vadd.f32 %v1401_v60, %v1400_v57  ;;  %v1410_v63 = vrot.slane %v1409_v61, 4  ;;  %v2512_v60 = vor.u32 %v2657_v56, %v2509_v58  ;;  %v2660_v56 = vld [vmem:[#allocation8 + $0x138] sm:$0xf0] }
 0x628   :  { %v1403_v1 = vrot.slane %v1402_v62, 2  ;;  %v1411_v2 = vadd.f32 %v1410_v63, %v1409_v61  ;;  %v2419_v61 = vld [vmem:[#allocation8 + $0x78] sm:$0xf]  ;;  %1881 = vmatpush.bf16.msra.mxu0 %v2512_v60 }
 0x62a   :  { %v1404_v3 = vadd.f32 %v1403_v1, %v1402_v62  ;;  %v1412_v4 = vrot.slane %v1411_v2, 2  ;;  %v2638_v62 = vld [vmem:[#allocation8 + $0x88] sm:$0xf0]  ;;  %v2481_v1 = vld [vmem:[#allocation8 + $0x104] sm:$0xf0] }
 0x62b   :  { %v2420_v63 = vor.u32 %v2638_v62, %v2419_v61  ;;  %v2631_v61 = vld [vmem:[#allocation8 + $0x54] sm:$0xf]  ;;  %v2401_v62 = vld [vmem:[#allocation8 + $0x64] sm:$0xf0] }
 0x62c   :  { %v1405_v6 = vrot.slane %v1404_v3, 1  ;;  %v1413_v7 = vadd.f32 %v1412_v4, %v1411_v2  ;;  %v2487_v2 = vld [vmem:[#allocation8 + $0xf8] sm:$0xf]  ;;  %v2654_v4 = vld [vmem:[#allocation8 + $0x108] sm:$0xf0] }
 0x62d   :  { %1843 = vmatpush.bf16.msrb.mxu1 %v2420_v63  ;;  %v2404_v63 = vor.u32 %v2631_v61, %v2401_v62 }
 0x62e   :  { %v1406_v8 = vadd.f32 %v1405_v6, %v1404_v3  ;;  %v1414_v9 = vrot.slane %v1413_v7, 1  ;;  %v2484_v3 = vor.u32 %v2651_v0, %v2481_v1  ;;  %v2489_v6 = vld [vmem:[#allocation8 + $0x10c] sm:$0xf0]  ;;  %v2407_v0 = vld [vmem:[#allocation8 + $0x58] sm:$0xf] }
 0x62f   :  { %v2634_v1 = vld [vmem:[#allocation8 + $0x68] sm:$0xf0] }
 0x630   :  { %v1415_v11 = vadd.f32 %v1414_v9, %v1413_v7  ;;  %v1416_v12 = vmul.f32 0.0625, %v1406_v8  ;;  %v2488_v7 = vor.u32 %v2654_v4, %v2487_v2  ;;  %v2492_v8 = vor.u32 %v2652_v5, %v2489_v6  ;;  %v2399_v9 = vld [vmem:[#allocation8 + $0x50] sm:$0xf]  ;;  %v2632_v2 = vld [vmem:[#allocation8 + $0x5c] sm:$0xf] }
 0x631   :  { %v2408_v5 = vor.u32 %v2634_v1, %v2407_v0  ;;  %v2409_v6 = vld [vmem:[#allocation8 + $0x6c] sm:$0xf0] }
 0x632   :  { %v1417_v13 = vmul.f32 0.0625, %v1415_v11  ;;  %v1418_v14 = vmul.f32 %v1416_v12, %v1416_v12  ;;  %v1435_v28 = vsub.f32 %v1395_v52, %v1416_v12  ;;  %v1436_v29 = vsub.f32 %v1397_v55, %v1416_v12  ;;  %v2501_v52 = vld [vmem:[#allocation8 + $0x12c] sm:$0xf0]  ;;  %v2659_v55 = vld [vmem:[#allocation8 + $0x130] sm:$0xf0]  ;;  %1882 = vmatpush.bf16.msra.mxu0 %v2492_v8 }
 0x633   :  { %v2504_v53 = vor.u32 %v2656_v51, %v2501_v52  ;;  %v2508_v57 = vor.u32 %v2659_v55, %v2507_v54  ;;  %v2400_v11 = vor.u32 %v2633_v10, %v2399_v9  ;;  %v2646_v12 = vld [vmem:[#allocation8 + $0xcc] sm:$0xf]  ;;  %v2428_v52 = vor.u32 %v2639_v48, %v2427_v47  ;;  %v2515_v54 = vld [vmem:[#allocation8 + $0x128] sm:$0xf]  ;;  %v2655_v9 = vld [vmem:[#allocation8 + $0x110] sm:$0xf0] }
 0x634   :  { %v1419_v16 = vsub.f32 %v1417_v13, %v1418_v14  ;;  %v2461_v13 = vld [vmem:[#allocation8 + $0xdc] sm:$0xf0]  ;;  %v2467_v14 = vld [vmem:[#allocation8 + $0xd0] sm:$0xf]  ;;  %v2516_v60 = vor.u32 %v2660_v56, %v2515_v54  ;;  %v2412_v8 = vor.u32 %v2632_v2, %v2409_v6  ;;  %v2436_v47 = vor.u32 %v2640_v45, %v2435_v44  ;;  %v2684_v6 = vld [vmem:[#allocation11 + $0x8] ss:$0 sm:$0xff] }
 0x635   :  { %1853 = vmatpush.bf16.msrb.mxu2 %v2504_v53  ;;  %1867 = vmatpush.bf16.msrb.mxu3 %v2508_v57  ;;  %v2464_v15 = vor.u32 %v2646_v12, %v2461_v13  ;;  %v2429_v53 = vld [vmem:[#allocation8 + $0x94] sm:$0xf0]  ;;  %v2626_v13 = vld [vmem:[#allocation8 + $0x2c] sm:$0xf]  ;;  %v2415_v48 = vld [vmem:[#allocation8 + $0x60] sm:$0xf] }
 0x636   :  { %v1420_v17 = vmax.f32 %v1419_v16, 0.0  ;;  %v2649_v16 = vld [vmem:[#allocation8 + $0xe0] sm:$0xf0]  ;;  %1844 = vmatpush.bf16.msrb.mxu1 %v2400_v11  ;;  %v2432_v55 = vor.u32 %v2637_v49, %v2429_v53  ;;  %v2635_v49 = vld [vmem:[#allocation8 + $0x70] sm:$0xf0] }
 0x637   :  { %v2375_v56 = vld [vmem:[#allocation8 + $0x10] sm:$0xf] }
 0x638   :  { %v1423_v18 = vadd.f32 1e-05, %v1420_v17  ;;  %v2647_v17 = vld [vmem:[#allocation8 + $0xd4] sm:$0xf] }
 0x639   :  { %1854 = vmatpush.bf16.msrb.mxu2 %v2484_v3  ;;  %1868 = vmatpush.bf16.msrb.mxu3 %v2488_v7  ;;  %v2495_v7 = vld [vmem:[#allocation8 + $0x100] sm:$0xf] }
 0x63a   :  { %2699 = vrsqrt.f32 %v1423_v18  ;;  %vm1430_vm6 = vweird.f32 %v1423_v18  ;;  %v2496_v12 = vor.u32 %v2655_v9, %v2495_v7 }
 0x63d   :  { %1855 = vmatpush.bf16.msrb.mxu2 %v2464_v15 }
 0x640   :  { %v2700_v19 = vpop.eup %2699 }
 0x641   :  { %v1425_v20 = vmul.f32 %v2700_v19, %v1423_v18  ;;  %vm1431_vm5 = vweird.f32 %v2700_v19  ;;  %v2469_v18 = vld [vmem:[#allocation8 + $0xe4] sm:$0xf0] }
 0x642   :  { %vm1432_vm7 = vmor %vm1430_vm6, %vm1431_vm5 }
 0x643   :  { %v1426_v21 = vmul.f32 %v2700_v19, %v1425_v20  ;;  %v2472_v20 = vor.u32 %v2647_v17, %v2469_v18  ;;  %v2629_v17 = vld [vmem:[#allocation8 + $0x40] sm:$0xf0]  ;;  %v2627_v18 = vld [vmem:[#allocation8 + $0x34] sm:$0xf] }
 0x645   :  { %v1427_v22 = vmul.f32 0.5, %v1426_v21  ;;  %1883 = vmatpush.bf16.msra.mxu0 %v2472_v20 }
 0x647   :  { %v1428_v23 = vsub.f32 1.5, %v1427_v22  ;;  %v2379_v22 = vld [vmem:[#allocation8 + $0x28] sm:$0xf] }
 0x649   :  { %v1429_v25 = vmul.f32 %v2700_v19, %v1428_v23  ;;  %v2628_v23 = vld [vmem:[#allocation8 + $0x38] sm:$0xf0] }
 0x64b   :  { %v1433_v26 = vsel %vm1432_vm7, %v2700_v19, %v1429_v25  ;;  %v2468_v19 = vor.u32 %v2649_v16, %v2467_v14  ;;  %v2381_v14 = vld [vmem:[#allocation8 + $0x3c] sm:$0xf0]  ;;  %v2387_v16 = vld [vmem:[#allocation8 + $0x30] sm:$0xf] }
 0x64c   :  { %v1434_v27 = vmul.f32 %v1433_v26, %v1421_v24  ;;  %v2384_v15 = vor.u32 %v2626_v13, %v2381_v14 }
 0x64d   :  { %1869 = vmatpush.bf16.msrb.mxu3 %v2468_v19 }
 0x64e   :  { %v1437_v30 = vperm.slane %v1434_v27, 0  ;;  %v2380_v27 = vor.u32 %v2628_v23, %v2379_v22  ;;  %v2388_v22 = vor.u32 %v2629_v17, %v2387_v16  ;;  %v2389_v23 = vld [vmem:[#allocation8 + $0x44] sm:$0xf0] }
 0x650   :  { %v1438_v32 = vmul.f32 %v1437_v30, %v1435_v28  ;;  %v1439_v33 = vmul.f32 %v1437_v30, %v1436_v29  ;;  %v2641_v28 = vld [vmem:[#allocation8 + $0xa4] sm:$0xf]  ;;  %v2441_v29 = vld [vmem:[#allocation8 + $0xb4] sm:$0xf0]  ;;  %v2447_v30 = vld [vmem:[#allocation8 + $0xa8] sm:$0xf]  ;;  %1845 = vmatpush.bf16.msrb.mxu1 %v2380_v27 }
 0x652   :  { %v1442_v34 = vadd.f32 %v2683_v31, %v1439_v33  ;;  %v1441_v35 = vadd.f32 %v2683_v31, %v1438_v32  ;;  %v2444_v31 = vor.u32 %v2641_v28, %v2441_v29  ;;  %v2644_v32 = vld [vmem:[#allocation8 + $0xb8] sm:$0xf0]  ;;  %v2642_v33 = vld [vmem:[#allocation8 + $0xac] sm:$0xf]  ;;  %v2621_v29 = vld [vmem:[#allocation8 + $0x4] sm:$0xf] }
 0x654   :  { %v1444_v36 = vmax.f32 %v1442_v34, 0.0  ;;  %v1443_v37 = vmax.f32 %v1441_v35, 0.0  ;;  %v2449_v34 = vld [vmem:[#allocation8 + $0xbc] sm:$0xf0]  ;;  %1856 = vmatpush.bf16.msrb.mxu2 %v2444_v31  ;;  %1846 = vmatpush.bf16.msrb.mxu1 %v2360_v43 }
 0x656   :  { %v1445_v38 = vpack.c.bf16 %v1444_v36, %v1443_v37  ;;  %v2448_v37 = vor.u32 %v2644_v32, %v2447_v30  ;;  %v2361_v30 = vld [vmem:[#allocation8 + $0x14] sm:$0xf0] }
 0x657   :  { %v2364_v32 = vor.u32 %v2621_v29, %v2361_v30 }
 0x658   :  { %1519 = vmatmul.bf16.vlgmr.msrb.gmra.mxu0 %v1445_v38  ;;  %v2452_v38 = vor.u32 %v2642_v33, %v2449_v34  ;;  %1870 = vmatpush.bf16.msrb.mxu3 %v2448_v37  ;;  %v2367_v33 = vld [vmem:[#allocation8 + $0x8] sm:$0xf]  ;;  %v2624_v34 = vld [vmem:[#allocation8 + $0x18] sm:$0xf0] }
 0x659   :  { %1857 = vmatpush.bf16.msrb.mxu2 %v2424_v46  ;;  %1895 = vmatpush.bf16.msra.mxu1 %v2516_v60  ;;  %v2368_v37 = vor.u32 %v2624_v34, %v2367_v33 }
 0x65a   :  { %1884 = vmatpush.bf16.msra.mxu0 %v2452_v38  ;;  %v2369_v38 = vld [vmem:[#allocation8 + $0x1c] sm:$0xf0] }
 0x65c   :  { %1871 = vmatpush.bf16.msrb.mxu3 %v2428_v52  ;;  %v2630_v52 = vld [vmem:[#allocation8 + $0x48] sm:$0xf0] }
 0x65d   :  { %1858 = vmatpush.bf16.msrb.mxu2 %v2404_v63  ;;  %1896 = vmatpush.bf16.msra.mxu1 %v2496_v12  ;;  %v1546_v63 = vld [vmem:[#allocation10 + $0x8] sm:$0x1] }
 0x65e   :  { %1885 = vmatpush.bf16.msra.mxu0 %v2432_v55 }
 0x660   :  { %1872 = vmatpush.bf16.msrb.mxu3 %v2408_v5 }
 0x661   :  { %1859 = vmatpush.bf16.msrb.mxu2 %v2384_v15 }
 0x662   :  { %1886 = vmatpush.bf16.msra.mxu0 %v2412_v8 }
 0x664   :  { %1873 = vmatpush.bf16.msrb.mxu3 %v2388_v22 }
 0x665   :  { %1860 = vmatpush.bf16.msrb.mxu2 %v2364_v32 }
 0x668   :  { %1874 = vmatpush.bf16.msrb.mxu3 %v2368_v37 }
 0x6d5   :  { %v2957_v59 = vpop.f32.mrf.mxu0 }
 0x6d6   :  { %v1532_v24 = vmul.f32 %v2957_v59, %v2957_v59 }
 0x6dd   :  { %v2959_v21 = vpop.f32.mrf.mxu0 }
 0x6de   :  { %v1525_v25 = vadd.f32 %v2959_v21, %v2957_v59  ;;  %v1533_v26 = vmul.f32 %v2959_v21, %v2959_v21 }
 0x6e0   :  { %v1526_v35 = vrot.slane %v1525_v25, 4  ;;  %v1534_v36 = vadd.f32 %v1533_v26, %v1532_v24  ;;  %v2392_v24 = vor.u32 %v2627_v18, %v2389_v23  ;;  %v2650_v26 = vld [vmem:[#allocation8 + $0xe8] sm:$0xf0] }
 0x6e2   :  { %v1527_v41 = vadd.f32 %v1526_v35, %v1525_v25  ;;  %v1535_v42 = vrot.slane %v1534_v36, 4  ;;  %v2475_v25 = vld [vmem:[#allocation8 + $0xd8] sm:$0xf]  ;;  %1887 = vmatpush.bf16.msra.mxu0 %v2392_v24  ;;  %v2622_v35 = vld [vmem:[#allocation8 + $0xc] sm:$0xf] }
 0x6e3   :  { %v2476_v31 = vor.u32 %v2650_v26, %v2475_v25 }
 0x6e4   :  { %v1528_v50 = vrot.slane %v1527_v41, 2  ;;  %v1536_v51 = vadd.f32 %v1535_v42, %v1534_v36  ;;  %v2456_v42 = vor.u32 %v2645_v40, %v2455_v39 }
 0x6e5   :  { %1897 = vmatpush.bf16.msra.mxu1 %v2476_v31 }
 0x6e6   :  { %v1529_v57 = vadd.f32 %v1528_v50, %v1527_v41  ;;  %v1537_v58 = vrot.slane %v1536_v51, 2  ;;  %v2372_v41 = vor.u32 %v2622_v35, %v2369_v38  ;;  %v2416_v50 = vor.u32 %v2635_v49, %v2415_v48 }
 0x6e8   :  { %v1530_v3 = vrot.slane %v1529_v57, 1  ;;  %v1538_v4 = vadd.f32 %v1537_v58, %v1536_v51  ;;  %1888 = vmatpush.bf16.msra.mxu0 %v2372_v41  ;;  %v2395_v51 = vld [vmem:[#allocation8 + $0x38] sm:$0xf] }
 0x6e9   :  { %1898 = vmatpush.bf16.msra.mxu1 %v2456_v42  ;;  %v2396_v55 = vor.u32 %v2630_v52, %v2395_v51 }
 0x6ea   :  { %v1531_v10 = vadd.f32 %v1530_v3, %v1529_v57  ;;  %v1539_v11 = vrot.slane %v1538_v4, 1  ;;  %v2625_v57 = vld [vmem:[#allocation8 + $0x20] sm:$0xf0] }
 0x6eb   :  { %v2376_v61 = vor.u32 %v2625_v57, %v2375_v56 }
 0x6ec   :  { %v1540_v19 = vadd.f32 %v1539_v11, %v1538_v4  ;;  %v2967_v20 = vmul.f32 0.0625, %v1531_v10 }
 0x6ed   :  { %1899 = vmatpush.bf16.msra.mxu1 %v2436_v47 }
 0x6ee   :  { %v1542_v27 = vmul.f32 0.0625, %v1540_v19  ;;  %v1543_v28 = vmul.f32 %v2967_v20, %v2967_v20  ;;  %v1560_v3 = vsub.f32 %v2957_v59, %v2967_v20  ;;  %v1561_v4 = vsub.f32 %v2959_v21, %v2967_v20  ;;  %v1619_v59 = vld [vmem:[%s2990_s6] sm:$0x1f]  ;;  %s2895_s6 = smov [#allocation13]  }
 0x6ef   :  { %v1621_v14 = vperm.slane %v1619_v59, 0  ;;  %v1624_v21 = vperm.slane %v1619_v59, 3  ;;  %v1622_v19 = vperm.slane %v1619_v59, 1  ;;  %v1623_v20 = vperm.slane %v1619_v59, 2  ;;  %s1923_s9 = sshll.u32 %s2895_s6, 4  ;;  %s1924_s9 = int_to_ptr.vmem [resolvable:$true] %s1923_s9 }
 0x6f0   :  { %v1544_v36 = vsub.f32 %v1542_v27, %v1543_v28  ;;  %v1625_v30 = vperm.slane %v1619_v59, 4 }
 0x6f1   :  { %1900 = vmatpush.bf16.msra.mxu1 %v2416_v50 }
 0x6f2   :  { %v1545_v43 = vmax.f32 %v1544_v36, 0.0 }
 0x6f4   :  { %v1548_v46 = vadd.f32 1e-05, %v1545_v43 }
 0x6f5   :  { %1901 = vmatpush.bf16.msra.mxu1 %v2396_v55 }
 0x6f6   :  { %2701 = vrsqrt.f32 %v1548_v46  ;;  %vm1555_vm9 = vweird.f32 %v1548_v46 }
 0x6f9   :  { %1902 = vmatpush.bf16.msra.mxu1 %v2376_v61 }
 0x6fc   :  { %v2702_v53 = vpop.eup %2701 }
 0x6fd   :  { %v1550_v54 = vmul.f32 %v2702_v53, %v1548_v46  ;;  %vm1556_vm8 = vweird.f32 %v2702_v53 }
 0x6fe   :  { %vm1557_vm10 = vmor %vm1555_vm9, %vm1556_vm8 }
 0x6ff   :  { %v1551_v58 = vmul.f32 %v2702_v53, %v1550_v54 }
 0x701   :  { %v1552_v60 = vmul.f32 0.5, %v1551_v58 }
 0x703   :  { %v1553_v62 = vsub.f32 1.5, %v1552_v60 }
 0x705   :  { %v1554_v0 = vmul.f32 %v2702_v53, %v1553_v62 }
 0x707   :  { %v1558_v1 = vsel %vm1557_vm10, %v2702_v53, %v1554_v0 }
 0x708   :  { %v1559_v2 = vmul.f32 %v1558_v1, %v1546_v63 }
 0x70a   :  { %v1562_v5 = vperm.slane %v1559_v2, 0 }
 0x70c   :  { %v1563_v7 = vmul.f32 %v1562_v5, %v1560_v3  ;;  %v1564_v8 = vmul.f32 %v1562_v5, %v1561_v4 }
 0x70e   :  { %v1566_v9 = vadd.f32 %v2684_v6, %v1563_v7  ;;  %v1567_v10 = vadd.f32 %v2684_v6, %v1564_v8 }
 0x710   :  { %v1568_v11 = vmax.f32 %v1566_v9, 0.0  ;;  %v1569_v12 = vmax.f32 %v1567_v10, 0.0 }
 0x712   :  { %v1570_v13 = vpack.c.bf16 %v1569_v12, %v1568_v11 }
 0x714   :  { %1847 = vmatmul.bf16.vlgmr.msrb.gmra.mxu1 %v1570_v13  ;;  %1861 = vmatmul.bf16.vlgmr.msrb.gmra.mxu2 %v1570_v13 }
 0x715   :  { %1875 = vmatmul.bf16.vlgmr.msrb.gmra.mxu3 %v1570_v13  ;;  %1889 = vmatmul.bf16.vlgmr.msra.gmra.mxu0 %v1570_v13 }
 0x724   :  { %1903 = vmatmul.bf16.vlgmr.msra.gmra.mxu1 %v1570_v13 }
 0x791   :  { %v1848_v15 = vpop.f32.mrf.mxu1 }
 0x792   :  { %v1849_v16 = vadd.f32 %v1848_v15, %v1621_v14  ;;  %v1890_v17 = vpop.f32.mrf.mxu0 }
 0x793   :  { %v1891_v18 = vadd.f32 %v1890_v17, %v1624_v21 }
 0x794   :  { %1909 = vst [vmem:[#allocation13] sm:$0xff] %v1849_v16 }
 0x795   :  { %1912 = vst [vmem:[#allocation13 + $0x18] sm:$0xff] %v1891_v18 }
 0x797   :  { %v1862_v22 = vpop.f32.mrf.mxu2 }
 0x798   :  { %v1863_v23 = vadd.f32 %v1862_v22, %v1622_v19  ;;  %v1876_v24 = vpop.f32.mrf.mxu3 }
 0x799   :  { %v1877_v25 = vadd.f32 %v1876_v24, %v1623_v20  ;;  %v1850_v26 = vpop.f32.mrf.mxu1 }
 0x79a   :  { %1910 = vst [vmem:[#allocation13 + $0x8] sm:$0xff] %v1863_v23  ;;  %v1851_v27 = vadd.f32 %v1850_v26, %v1621_v14  ;;  %v1892_v28 = vpop.f32.mrf.mxu0 }
 0x79b   :  { %1911 = vst [vmem:[#allocation13 + $0x10] sm:$0xff] %v1877_v25  ;;  %v1893_v29 = vadd.f32 %v1892_v28, %v1624_v21 }
 0x79c   :  { %1914 = vst [vmem:[#allocation13 + $0x28] sm:$0xff] %v1851_v27 }
 0x79d   :  { %1917 = vst [vmem:[#allocation13 + $0x40] sm:$0xff] %v1893_v29 }
 0x79f   :  { %v1864_v31 = vpop.f32.mrf.mxu2 }
 0x7a0   :  { %v1865_v32 = vadd.f32 %v1864_v31, %v1622_v19  ;;  %v1878_v33 = vpop.f32.mrf.mxu3 }
 0x7a1   :  { %v1879_v34 = vadd.f32 %v1878_v33, %v1623_v20  ;;  %v1904_v35 = vpop.f32.mrf.mxu1 }
 0x7a2   :  { %1915 = vst [vmem:[#allocation13 + $0x30] sm:$0xff] %v1865_v32  ;;  %v1905_v36 = vadd.f32 %v1904_v35, %v1625_v30 }
 0x7a3   :  { %1916 = vst [vmem:[#allocation13 + $0x38] sm:$0xff] %v1879_v34 }
 0x7a4   :  { %1913 = vst [vmem:[#allocation13 + $0x20] sm:$0xff] %v1905_v36 }
 0x7a9   :  { %v1906_v37 = vpop.f32.mrf.mxu1 }
 0x7aa   :  { %v1907_v38 = vadd.f32 %v1906_v37, %v1625_v30 }
 0x7ac   :  { %1918 = vst [vmem:[#allocation13 + $0x48] sm:$0xff] %v1907_v38 }
 0x7ad   :  { %1931 = dma.vmem_to_hbm [thread:$0]  %s1924_s9, 1280, %s1926_s1, [#allocation4], %s2888_s21, %s2888_s21, %s2889_s22  }
 0x7ae   :  { %2879 = dma.done.wait [#allocation4], 1280  }
 0x7af   :  { %2880 = vsyncadd [#allocation4], 4294966016 }
 0x7b0   :  { %1936 = vsyncpa [#allocation3], 1 }
 0x7b1   :  { %1937 = vsyncpa [#allocation6], 1 }
 0x7b2   :  { %1938 = vsyncpa [#allocation9], 1 }
 0x7b3   :  { %1939 = vsyncpa [#allocation12], 1 }
 0x7b4   :  { %1940 = vsyncpa [#allocation4], 1 }

</bundles_post_ra>
